<compile_context>
chip_gen: v5e
topology: v5e:2x2
jax: 0.10.0
libtpu: 0.0.40
codegen_flags: <defaults>
</compile_context>

<pallas_src>
import jax
import jax.numpy as jnp
from jax import lax
from jax.experimental import pallas as pl
from jax.experimental.pallas import tpu as pltpu

DIRE_OUTPUT_SIZE = 32   # GRU input dim and final_attn output dim
HIDDEN_SIZE = 20
NUM_LAYERS = 1          # module hard-codes bidirectional=True in nn.GRU
BIDIR_FACTOR = 2

GATE_PAD = 128          # each GRU gate padded to a full 128-lane group
OUT_PAD = 128           # final_attn output padded to a full lane group


def _round_up(n, m):
    return ((n + m - 1) // m) * m


def rnn_summerizer_kernel(x_ref,          # (T*Bt, D)    time-major flat tile
                          w_ih_f_ref,     # (D, 3*GP)    fwd input weights [r|z|n]
                          b_ih_f_ref,     # (1, 3*GP)    fwd b_ih + b_hh_{r,z} folded (f32)
                          w_hh_f_ref,     # (GP, 3*GP)   fwd recurrent weights
                          b_hh_n_f_ref,   # (1, GP)      fwd b_hh n-gate (f32)
                          w_ih_b_ref,     # (D, 3*GP)    bwd input weights [r|z|n]
                          b_ih_b_ref,     # (1, 3*GP)    bwd b_ih + b_hh_{r,z} folded (f32)
                          b_hh_n_b_ref,   # (1, GP)      bwd b_hh n-gate (f32)
                          w_attn_f_ref,   # (GP, OUT_PAD) final_attn rows for h_f
                          w_attn_b_ref,   # (GP, OUT_PAD) final_attn rows for h_b
                          b_attn_ref,     # (1, OUT_PAD)  (f32)
                          out_ref,        # (Bt, OUT_PAD)
                          gi_ref):        # VMEM scratch (T*Bt, 3*GP) f32
    TB, _ = x_ref.shape
    B = out_ref.shape[0]
    T = TB // B
    GP = GATE_PAD
    cdt = w_hh_f_ref.dtype            # MXU input dtype (f32 or bf16)

    # ---- Hoisted FORWARD input projection: one (T*Bt, D)x(D, 3*GP) matmul
    # covering every timestep; parked in VMEM scratch so the recurrence only
    # keeps a single step's slice live.
    gi_ref[...] = (jnp.dot(x_ref[...], w_ih_f_ref[...],
                           preferred_element_type=jnp.float32)
                   + b_ih_f_ref[...])

    # ---- Forward recurrence (the only serial chain). Gate slices land on
    # 128-lane boundaries; per step: (Bt, GP)x(GP, 3*GP) matmul + gate math.
    def step(t, h):
        start = pl.multiple_of(t * B, 8)
        gi_t = gi_ref[pl.ds(start, B), :]                            # (Bt, 3*GP) f32
        gh = jnp.dot(h.astype(cdt), w_hh_f_ref[...],
                     preferred_element_type=jnp.float32)             # (Bt, 3*GP)
        rz = jax.nn.sigmoid(gi_t[:, :2 * GP] + gh[:, :2 * GP])       # fused r|z
        r = rz[:, :GP]
        z = rz[:, GP:]
        n = jnp.tanh(gi_t[:, 2 * GP:] + r * (gh[:, 2 * GP:] + b_hh_n_f_ref[...]))
        return (1.0 - z) * n + z * h

    unroll = next(u for u in (8, 4, 2, 1) if T % u == 0)
    h_f = lax.fori_loop(0, T, step, jnp.zeros((B, GP), jnp.float32),
                        unroll=unroll)

    # ---- Backward direction: single cell step on x[T-1] with h0 = 0
    # (=> gh = b_hh, already folded into the bias). Computed after the
    # recurrence so nothing extra is live across the serial chain.
    x_last = x_ref[(T - 1) * B:T * B, :]
    gi_b = (jnp.dot(x_last, w_ih_b_ref[...],
                    preferred_element_type=jnp.float32)
            + b_ih_b_ref[...])                                       # (Bt, 3*GP)
    rz_b = jax.nn.sigmoid(gi_b[:, :2 * GP])
    z_b = rz_b[:, GP:]
    n_b = jnp.tanh(gi_b[:, 2 * GP:] + rz_b[:, :GP] * b_hh_n_b_ref[...])
    h_b = (1.0 - z_b) * n_b                                          # + z_b * 0

    # ---- final_attn as two half matmuls (no lane concat); output is a full
    # 128-lane group => unmasked, lane-dense stores.
    out = (jnp.dot(h_f.astype(cdt), w_attn_f_ref[...],
                   preferred_element_type=jnp.float32)
           + jnp.dot(h_b.astype(cdt), w_attn_b_ref[...],
                     preferred_element_type=jnp.float32)
           + b_attn_ref[...])
    out_ref[...] = out.astype(out_ref.dtype)


def _pack_params(params, compute_dtype=jnp.float32):
    """Repack PyTorch-layout params into the lane-aligned kernel layout."""
    H, GP = HIDDEN_SIZE, GATE_PAD
    D = params["w_ih_f"].shape[0]
    OUT = params["w_attn"].shape[1]

    def pad_gates(w, n_rows):            # (rows, 3H) -> (n_rows, 3*GP)
        out = jnp.zeros((n_rows, 3 * GP), jnp.float32)
        r = w.shape[0]
        for g in range(3):
            out = out.at[:r, g * GP:g * GP + H].set(w[:, g * H:(g + 1) * H])
        return out

    def fold_bias(b_ih, b_hh):
        # Fold b_ih (all gates) + b_hh_{r,z} into the hoisted projection;
        # b_hh_n must stay inside the r-gated term, so it is kept separate.
        b_hh_rz = jnp.concatenate(
            [b_hh[:, :2 * H], jnp.zeros((1, H), jnp.float32)], axis=1)
        return pad_gates(b_ih, 1) + pad_gates(b_hh_rz, 1)

    def pad_row(b):                      # (1, H) -> (1, GP)
        return jnp.zeros((1, GP), jnp.float32).at[:, :H].set(b)

    w_attn = params["w_attn"]            # (2H, OUT)
    w_attn_f = jnp.zeros((GP, OUT_PAD), jnp.float32).at[:H, :OUT].set(w_attn[:H])
    w_attn_b = jnp.zeros((GP, OUT_PAD), jnp.float32).at[:H, :OUT].set(w_attn[H:])
    b_attn = jnp.zeros((1, OUT_PAD), jnp.float32).at[:, :OUT].set(params["b_attn"])

    cdt = compute_dtype
    return (
        pad_gates(params["w_ih_f"], D).astype(cdt),        # w_ih_f  (MXU input)
        fold_bias(params["b_ih_f"], params["b_hh_f"]),     # b_ih_f  (f32)
        pad_gates(params["w_hh_f"], GP).astype(cdt),       # w_hh_f  (MXU input)
        pad_row(params["b_hh_f"][:, 2 * H:]),               # b_hh_n_f (f32)
        pad_gates(params["w_ih_b"], D).astype(cdt),        # w_ih_b  (MXU input)
        fold_bias(params["b_ih_b"], params["b_hh_b"]),     # b_ih_b  (f32)
        pad_row(params["b_hh_b"][:, 2 * H:]),               # b_hh_n_b (f32)
        w_attn_f.astype(cdt),                               # w_attn_f (MXU input)
        w_attn_b.astype(cdt),                               # w_attn_b (MXU input)
        b_attn,                                             # b_attn  (f32)
    )


def _choose_b_tile(B, T):
    # Fill the MXU M-dim (128 rows) when the batch allows it, but keep the
    # (T*Bt, 3*GP) f32 projection scratch inside a conservative VMEM budget
    # (matters most on v7x's 64 MiB part). Never below 8 (one vreg of sublanes).
    bt = min(128, _round_up(B, 8))
    gi_row_bytes = 3 * GATE_PAD * 4
    budget = 20 * 2**20
    cap = max(8, (budget // (T * gi_row_bytes)) // 8 * 8)
    # TODO(synk): for very long T, chunk the hoisted projection in T-blocks
    # inside the kernel instead of shrinking the batch tile.
    return int(max(8, min(bt, cap)))


def rnn_summerizer_forward(x, params, compute_dtype=jnp.float32):
    """Pallas-backed forward pass. x: (B, T, DIRE_OUTPUT_SIZE) float32."""
    B, T, D = x.shape
    OUT = params["w_attn"].shape[1]
    packed = _pack_params(params, compute_dtype)

    b_tile = _choose_b_tile(B, T)
    B_pad = _round_up(B, b_tile)
    n_tiles = B_pad // b_tile

    # Layout plumbing in the wrapper (cheap XLA ops): pad batch to a multiple
    # of the tile, go time-major, and flatten each batch tile's sequence into
    # a lane-dense (T*Bt, D) slab so the kernel body is purely 2D.
    x_tbd = jnp.transpose(x, (1, 0, 2))                          # (T, B, D)
    if B_pad != B:
        x_tbd = jnp.pad(x_tbd, ((0, 0), (0, B_pad - B), (0, 0)))
    x_flat = (x_tbd.reshape(T, n_tiles, b_tile, D)
              .transpose(1, 0, 2, 3)
              .reshape(n_tiles, T * b_tile, D)).astype(compute_dtype)

    x_spec = pl.BlockSpec((pl.Squeezed(), T * b_tile, D), lambda i: (i, 0, 0))
    full2d = lambda p: pl.BlockSpec(p.shape, lambda i: (0, 0))
    in_specs = [x_spec] + [full2d(p) for p in packed]
    out_specs = pl.BlockSpec((b_tile, OUT_PAD), lambda i: (i, 0))

    # Rough VMEM footprint (x block + weights double-buffered, projection
    # scratch, output block); raise the scoped limit only when needed.
    item = jnp.dtype(compute_dtype).itemsize
    est = (2 * T * b_tile * D * item
           + T * b_tile * 3 * GATE_PAD * 4
           + 2 * sum(int(p.size) * p.dtype.itemsize for p in packed)
           + 2 * b_tile * OUT_PAD * 4)
    vmem_limit = int(min(110 * 2**20, est + 16 * 2**20)) if est > 24 * 2**20 else None

    out = pl.pallas_call(
        rnn_summerizer_kernel,
        out_shape=jax.ShapeDtypeStruct((B_pad, OUT_PAD), jnp.float32),
        grid_spec=pltpu.PrefetchScalarGridSpec(
            num_scalar_prefetch=0,
            grid=(n_tiles,),
            in_specs=in_specs,
            out_specs=out_specs,
            scratch_shapes=[pltpu.VMEM((T * b_tile, 3 * GATE_PAD), jnp.float32)]),
        compiler_params=pltpu.CompilerParams(
            dimension_semantics=("parallel",),
            vmem_limit_bytes=vmem_limit),
    )(x_flat, *packed)
    return out[:B, :OUT]


def init_params(key, input_dim=DIRE_OUTPUT_SIZE, hidden=HIDDEN_SIZE):
    """Deterministic synthetic parameters (PyTorch-style uniform init)."""
    ks = jax.random.split(key, 10)
    s = 1.0 / jnp.sqrt(hidden)
    u = lambda k, shape: jax.random.uniform(k, shape, jnp.float32, -s, s)
    return {
        # forward direction (transposed relative to torch's (3H, in)); gate
        # order [r, z, n] along the 3H axis, matching PyTorch.
        "w_ih_f": u(ks[0], (input_dim, 3 * hidden)),
        "w_hh_f": u(ks[1], (hidden, 3 * hidden)),
        "b_ih_f": u(ks[2], (1, 3 * hidden)),
        "b_hh_f": u(ks[3], (1, 3 * hidden)),
        # reverse direction
        "w_ih_b": u(ks[4], (input_dim, 3 * hidden)),
        "w_hh_b": u(ks[5], (hidden, 3 * hidden)),
        "b_ih_b": u(ks[6], (1, 3 * hidden)),
        "b_hh_b": u(ks[7], (1, 3 * hidden)),
        # final_attn: Linear(2*hidden, DIRE_OUTPUT_SIZE), stored transposed
        "w_attn": u(ks[8], (BIDIR_FACTOR * NUM_LAYERS * hidden, DIRE_OUTPUT_SIZE)),
        "b_attn": u(ks[9], (1, DIRE_OUTPUT_SIZE)),
    }


def _reference_forward(x, p):
    """Pure-JAX reference mirroring the PyTorch module, for a correctness check."""
    B, T, D = x.shape
    H = HIDDEN_SIZE

    def cell(x_t, h, wi, wh, bi, bh):
        gi = x_t @ wi + bi
        gh = h @ wh + bh
        r = jax.nn.sigmoid(gi[:, :H] + gh[:, :H])
        z = jax.nn.sigmoid(gi[:, H:2 * H] + gh[:, H:2 * H])
        n = jnp.tanh(gi[:, 2 * H:] + r * gh[:, 2 * H:])
        return (1.0 - z) * n + z * h

    h_f = jnp.zeros((B, H), jnp.float32)
    for t in range(T):
        h_f = cell(x[:, t, :], h_f, p["w_ih_f"], p["w_hh_f"],
                   p["b_ih_f"], p["b_hh_f"])
    h_b = cell(x[:, T - 1, :], jnp.zeros((B, H), jnp.float32),
               p["w_ih_b"], p["w_hh_b"], p["b_ih_b"], p["b_hh_b"])
    hidden = jnp.concatenate([h_f, h_b], axis=-1)
    return hidden @ p["w_attn"] + p["b_attn"]


if __name__ == "__main__":
    key = jax.random.PRNGKey(0)
    k_x, k_p, k_x2 = jax.random.split(key, 3)

    params = init_params(k_p)

    # Small shape implied by the module: batch=2, seq=8, feature=DIRE_OUTPUT_SIZE.
    B, T, D = 2, 8, DIRE_OUTPUT_SIZE
    x = jax.random.normal(k_x, (B, T, D), jnp.float32)
    ref = _reference_forward(x, params)

    # f32 path — tight numerical check.
    out = jax.block_until_ready(rnn_summerizer_forward(x, params))
    assert out.shape == (B, DIRE_OUTPUT_SIZE)
    assert jnp.allclose(out, ref, atol=1e-4, rtol=1e-4)

    # bf16 MXU-input path (production config: halves DMA / weight VMEM) —
    # gate math stays f32, so only a loose check is meaningful.
    out_bf16 = jax.block_until_ready(
        rnn_summerizer_forward(x, params, compute_dtype=jnp.bfloat16))
    assert out_bf16.shape == (B, DIRE_OUTPUT_SIZE)
    assert float(jnp.max(jnp.abs(out_bf16 - ref))) < 1e-1

    # Larger batch exercises B_TILE=128 (full MXU M-dim), a multi-tile grid,
    # batch padding and the split backward projection.
    B2, T2 = 200, 12
    x2 = jax.random.normal(k_x2, (B2, T2, D), jnp.float32)
    out2 = jax.block_until_ready(rnn_summerizer_forward(x2, params))
    ref2 = _reference_forward(x2, params)
    assert out2.shape == (B2, DIRE_OUTPUT_SIZE)
    assert jnp.allclose(out2, ref2, atol=1e-3, rtol=1e-3)

    print("KERNEL_OK")
</pallas_src>

<mosaic_0001>
module attributes {stable_mosaic.version = 11 : i64} {
  func.func @rnn_summerizer_kernel(%arg0: i32, %arg1: memref<1x64x32xf32, #tpu.memory_space<vmem>>, %arg2: memref<32x384xf32, #tpu.memory_space<vmem>>, %arg3: memref<1x384xf32, #tpu.memory_space<vmem>>, %arg4: memref<128x384xf32, #tpu.memory_space<vmem>>, %arg5: memref<1x128xf32, #tpu.memory_space<vmem>>, %arg6: memref<32x384xf32, #tpu.memory_space<vmem>>, %arg7: memref<1x384xf32, #tpu.memory_space<vmem>>, %arg8: memref<1x128xf32, #tpu.memory_space<vmem>>, %arg9: memref<128x128xf32, #tpu.memory_space<vmem>>, %arg10: memref<128x128xf32, #tpu.memory_space<vmem>>, %arg11: memref<1x128xf32, #tpu.memory_space<vmem>>, %arg12: memref<8x128xf32, #tpu.memory_space<vmem>>, %arg13: memref<64x384xf32, #tpu.memory_space<vmem>>) attributes {dimension_semantics = [#tpu.dimension_semantics<parallel>], iteration_bounds = array<i64: 1>, scalar_prefetch = 0 : i64, scratch_operands = 1 : i64, tpu.core_type = #tpu.core_type<tc>, window_params = [{transform_indices = @transform_0, window_bounds = array<i64: 1, 64, 32>}, {pipeline_mode = #tpu.pipeline_mode<synchronous>, transform_indices = @transform_1, window_bounds = array<i64: 32, 384>}, {pipeline_mode = #tpu.pipeline_mode<synchronous>, transform_indices = @transform_2, window_bounds = array<i64: 1, 384>}, {pipeline_mode = #tpu.pipeline_mode<synchronous>, transform_indices = @transform_3, window_bounds = array<i64: 128, 384>}, {pipeline_mode = #tpu.pipeline_mode<synchronous>, transform_indices = @transform_4, window_bounds = array<i64: 1, 128>}, {pipeline_mode = #tpu.pipeline_mode<synchronous>, transform_indices = @transform_5, window_bounds = array<i64: 32, 384>}, {pipeline_mode = #tpu.pipeline_mode<synchronous>, transform_indices = @transform_6, window_bounds = array<i64: 1, 384>}, {pipeline_mode = #tpu.pipeline_mode<synchronous>, transform_indices = @transform_7, window_bounds = array<i64: 1, 128>}, {pipeline_mode = #tpu.pipeline_mode<synchronous>, transform_indices = @transform_8, window_bounds = array<i64: 128, 128>}, {pipeline_mode = #tpu.pipeline_mode<synchronous>, transform_indices = @transform_9, window_bounds = array<i64: 128, 128>}, {pipeline_mode = #tpu.pipeline_mode<synchronous>, transform_indices = @transform_10, window_bounds = array<i64: 1, 128>}, {transform_indices = @transform_11, window_bounds = array<i64: 8, 128>}]} {
    %c0 = arith.constant 0 : index
    %c0_0 = arith.constant 0 : index
    %c0_1 = arith.constant 0 : index
    %0 = vector.load %arg1[%c0, %c0_0, %c0_1] : memref<1x64x32xf32, #tpu.memory_space<vmem>>, vector<1x64x32xf32>
    %1 = vector.shape_cast %0 : vector<1x64x32xf32> to vector<64x32xf32>
    %c0_2 = arith.constant 0 : index
    %c0_3 = arith.constant 0 : index
    %2 = vector.load %arg2[%c0_2, %c0_3] : memref<32x384xf32, #tpu.memory_space<vmem>>, vector<32x384xf32>
    %cst = arith.constant dense<0.000000e+00> : vector<64x384xf32>
    %3 = tpu.matmul %1, %2, %cst {dimension_numbers = #tpu.dot_dimension_numbers<[1], [0], [0], [1], [0, 0, 1, 1], [], []>} : vector<64x32xf32>, vector<32x384xf32>, vector<64x384xf32> -> vector<64x384xf32>
    %c0_4 = arith.constant 0 : index
    %c0_5 = arith.constant 0 : index
    %4 = vector.load %arg3[%c0_4, %c0_5] : memref<1x384xf32, #tpu.memory_space<vmem>>, vector<1x384xf32>
    %5 = vector.broadcast %4 : vector<1x384xf32> to vector<64x384xf32>
    %6 = arith.addf %3, %5 : vector<64x384xf32>
    %c0_6 = arith.constant 0 : index
    %c0_7 = arith.constant 0 : index
    %7 = vector.load %arg13[%c0_6, %c0_7] : memref<64x384xf32, #tpu.memory_space<vmem>>, vector<64x384xf32>
    tpu.vector_store %arg13[%c0_6, %c0_7], %6 {strides = array<i32>} : memref<64x384xf32, #tpu.memory_space<vmem>>, vector<64x384xf32>,
    %cst_8 = arith.constant 0.000000e+00 : f32
    %8 = vector.broadcast %cst_8 : f32 to vector<8x128xf32>
    %c0_i32 = arith.constant 0 : i32
    %c8_i32 = arith.constant 8 : i32
    %9 = arith.muli %c0_i32, %c8_i32 : i32
    %10 = tpu.assume_multiple %9, 8 : i32
    %11 = arith.index_cast %10 : i32 to index
    %c0_9 = arith.constant 0 : index
    %12 = vector.load %arg13[%11, %c0_9] : memref<64x384xf32, #tpu.memory_space<vmem>>, vector<8x384xf32>
    %c0_10 = arith.constant 0 : index
    %c0_11 = arith.constant 0 : index
    %13 = vector.load %arg4[%c0_10, %c0_11] : memref<128x384xf32, #tpu.memory_space<vmem>>, vector<128x384xf32>
    %cst_12 = arith.constant dense<0.000000e+00> : vector<8x384xf32>
    %14 = tpu.matmul %8, %13, %cst_12 {dimension_numbers = #tpu.dot_dimension_numbers<[1], [0], [0], [1], [0, 0, 1, 1], [], []>} : vector<8x128xf32>, vector<128x384xf32>, vector<8x384xf32> -> vector<8x384xf32>
    %15 = vector.extract_strided_slice %12 {offsets = [0, 0], sizes = [8, 256], strides = [1, 1]} : vector<8x384xf32> to vector<8x256xf32>
    %16 = vector.extract_strided_slice %14 {offsets = [0, 0], sizes = [8, 256], strides = [1, 1]} : vector<8x384xf32> to vector<8x256xf32>
    %17 = arith.addf %15, %16 : vector<8x256xf32>
    %18 = arith.negf %17 : vector<8x256xf32>
    %19 = math.exp %18 : vector<8x256xf32>
    %cst_13 = arith.constant 1.000000e+00 : f32
    %20 = vector.broadcast %cst_13 : f32 to vector<8x256xf32>
    %21 = arith.addf %20, %19 : vector<8x256xf32>
    %22 = arith.divf %20, %21 : vector<8x256xf32>
    %23 = vector.extract_strided_slice %22 {offsets = [0, 0], sizes = [8, 128], strides = [1, 1]} : vector<8x256xf32> to vector<8x128xf32>
    %24 = vector.extract_strided_slice %22 {offsets = [0, 128], sizes = [8, 128], strides = [1, 1]} : vector<8x256xf32> to vector<8x128xf32>
    %25 = vector.extract_strided_slice %12 {offsets = [0, 256], sizes = [8, 128], strides = [1, 1]} : vector<8x384xf32> to vector<8x128xf32>
    %26 = vector.extract_strided_slice %14 {offsets = [0, 256], sizes = [8, 128], strides = [1, 1]} : vector<8x384xf32> to vector<8x128xf32>
    %c0_14 = arith.constant 0 : index
    %c0_15 = arith.constant 0 : index
    %27 = vector.load %arg5[%c0_14, %c0_15] : memref<1x128xf32, #tpu.memory_space<vmem>>, vector<1x128xf32>
    %28 = vector.broadcast %27 : vector<1x128xf32> to vector<8x128xf32>
    %29 = arith.addf %26, %28 : vector<8x128xf32>
    %30 = arith.mulf %23, %29 : vector<8x128xf32>
    %31 = arith.addf %25, %30 : vector<8x128xf32>
    %32 = math.tanh %31 : vector<8x128xf32>
    %cst_16 = arith.constant 1.000000e+00 : f32
    %33 = vector.broadcast %cst_16 : f32 to vector<8x128xf32>
    %34 = arith.subf %33, %24 : vector<8x128xf32>
    %35 = arith.mulf %34, %32 : vector<8x128xf32>
    %36 = arith.mulf %24, %8 : vector<8x128xf32>
    %37 = arith.addf %35, %36 : vector<8x128xf32>
    %c1_i32 = arith.constant 1 : i32
    %c8_i32_17 = arith.constant 8 : i32
    %38 = arith.muli %c1_i32, %c8_i32_17 : i32
    %39 = tpu.assume_multiple %38, 8 : i32
    %40 = arith.index_cast %39 : i32 to index
    %c0_18 = arith.constant 0 : index
    %41 = vector.load %arg13[%40, %c0_18] : memref<64x384xf32, #tpu.memory_space<vmem>>, vector<8x384xf32>
    %c0_19 = arith.constant 0 : index
    %c0_20 = arith.constant 0 : index
    %42 = vector.load %arg4[%c0_19, %c0_20] : memref<128x384xf32, #tpu.memory_space<vmem>>, vector<128x384xf32>
    %cst_21 = arith.constant dense<0.000000e+00> : vector<8x384xf32>
    %43 = tpu.matmul %37, %42, %cst_21 {dimension_numbers = #tpu.dot_dimension_numbers<[1], [0], [0], [1], [0, 0, 1, 1], [], []>} : vector<8x128xf32>, vector<128x384xf32>, vector<8x384xf32> -> vector<8x384xf32>
    %44 = vector.extract_strided_slice %41 {offsets = [0, 0], sizes = [8, 256], strides = [1, 1]} : vector<8x384xf32> to vector<8x256xf32>
    %45 = vector.extract_strided_slice %43 {offsets = [0, 0], sizes = [8, 256], strides = [1, 1]} : vector<8x384xf32> to vector<8x256xf32>
    %46 = arith.addf %44, %45 : vector<8x256xf32>
    %47 = arith.negf %46 : vector<8x256xf32>
    %48 = math.exp %47 : vector<8x256xf32>
    %cst_22 = arith.constant 1.000000e+00 : f32
    %49 = vector.broadcast %cst_22 : f32 to vector<8x256xf32>
    %50 = arith.addf %49, %48 : vector<8x256xf32>
    %51 = arith.divf %49, %50 : vector<8x256xf32>
    %52 = vector.extract_strided_slice %51 {offsets = [0, 0], sizes = [8, 128], strides = [1, 1]} : vector<8x256xf32> to vector<8x128xf32>
    %53 = vector.extract_strided_slice %51 {offsets = [0, 128], sizes = [8, 128], strides = [1, 1]} : vector<8x256xf32> to vector<8x128xf32>
    %54 = vector.extract_strided_slice %41 {offsets = [0, 256], sizes = [8, 128], strides = [1, 1]} : vector<8x384xf32> to vector<8x128xf32>
    %55 = vector.extract_strided_slice %43 {offsets = [0, 256], sizes = [8, 128], strides = [1, 1]} : vector<8x384xf32> to vector<8x128xf32>
    %c0_23 = arith.constant 0 : index
    %c0_24 = arith.constant 0 : index
    %56 = vector.load %arg5[%c0_23, %c0_24] : memref<1x128xf32, #tpu.memory_space<vmem>>, vector<1x128xf32>
    %57 = vector.broadcast %56 : vector<1x128xf32> to vector<8x128xf32>
    %58 = arith.addf %55, %57 : vector<8x128xf32>
    %59 = arith.mulf %52, %58 : vector<8x128xf32>
    %60 = arith.addf %54, %59 : vector<8x128xf32>
    %61 = math.tanh %60 : vector<8x128xf32>
    %cst_25 = arith.constant 1.000000e+00 : f32
    %62 = vector.broadcast %cst_25 : f32 to vector<8x128xf32>
    %63 = arith.subf %62, %53 : vector<8x128xf32>
    %64 = arith.mulf %63, %61 : vector<8x128xf32>
    %65 = arith.mulf %53, %37 : vector<8x128xf32>
    %66 = arith.addf %64, %65 : vector<8x128xf32>
    %c2_i32 = arith.constant 2 : i32
    %c8_i32_26 = arith.constant 8 : i32
    %67 = arith.muli %c2_i32, %c8_i32_26 : i32
    %68 = tpu.assume_multiple %67, 8 : i32
    %69 = arith.index_cast %68 : i32 to index
    %c0_27 = arith.constant 0 : index
    %70 = vector.load %arg13[%69, %c0_27] : memref<64x384xf32, #tpu.memory_space<vmem>>, vector<8x384xf32>
    %c0_28 = arith.constant 0 : index
    %c0_29 = arith.constant 0 : index
    %71 = vector.load %arg4[%c0_28, %c0_29] : memref<128x384xf32, #tpu.memory_space<vmem>>, vector<128x384xf32>
    %cst_30 = arith.constant dense<0.000000e+00> : vector<8x384xf32>
    %72 = tpu.matmul %66, %71, %cst_30 {dimension_numbers = #tpu.dot_dimension_numbers<[1], [0], [0], [1], [0, 0, 1, 1], [], []>} : vector<8x128xf32>, vector<128x384xf32>, vector<8x384xf32> -> vector<8x384xf32>
    %73 = vector.extract_strided_slice %70 {offsets = [0, 0], sizes = [8, 256], strides = [1, 1]} : vector<8x384xf32> to vector<8x256xf32>
    %74 = vector.extract_strided_slice %72 {offsets = [0, 0], sizes = [8, 256], strides = [1, 1]} : vector<8x384xf32> to vector<8x256xf32>
    %75 = arith.addf %73, %74 : vector<8x256xf32>
    %76 = arith.negf %75 : vector<8x256xf32>
    %77 = math.exp %76 : vector<8x256xf32>
    %cst_31 = arith.constant 1.000000e+00 : f32
    %78 = vector.broadcast %cst_31 : f32 to vector<8x256xf32>
    %79 = arith.addf %78, %77 : vector<8x256xf32>
    %80 = arith.divf %78, %79 : vector<8x256xf32>
    %81 = vector.extract_strided_slice %80 {offsets = [0, 0], sizes = [8, 128], strides = [1, 1]} : vector<8x256xf32> to vector<8x128xf32>
    %82 = vector.extract_strided_slice %80 {offsets = [0, 128], sizes = [8, 128], strides = [1, 1]} : vector<8x256xf32> to vector<8x128xf32>
    %83 = vector.extract_strided_slice %70 {offsets = [0, 256], sizes = [8, 128], strides = [1, 1]} : vector<8x384xf32> to vector<8x128xf32>
    %84 = vector.extract_strided_slice %72 {offsets = [0, 256], sizes = [8, 128], strides = [1, 1]} : vector<8x384xf32> to vector<8x128xf32>
    %c0_32 = arith.constant 0 : index
    %c0_33 = arith.constant 0 : index
    %85 = vector.load %arg5[%c0_32, %c0_33] : memref<1x128xf32, #tpu.memory_space<vmem>>, vector<1x128xf32>
    %86 = vector.broadcast %85 : vector<1x128xf32> to vector<8x128xf32>
    %87 = arith.addf %84, %86 : vector<8x128xf32>
    %88 = arith.mulf %81, %87 : vector<8x128xf32>
    %89 = arith.addf %83, %88 : vector<8x128xf32>
    %90 = math.tanh %89 : vector<8x128xf32>
    %cst_34 = arith.constant 1.000000e+00 : f32
    %91 = vector.broadcast %cst_34 : f32 to vector<8x128xf32>
    %92 = arith.subf %91, %82 : vector<8x128xf32>
    %93 = arith.mulf %92, %90 : vector<8x128xf32>
    %94 = arith.mulf %82, %66 : vector<8x128xf32>
    %95 = arith.addf %93, %94 : vector<8x128xf32>
    %c3_i32 = arith.constant 3 : i32
    %c8_i32_35 = arith.constant 8 : i32
    %96 = arith.muli %c3_i32, %c8_i32_35 : i32
    %97 = tpu.assume_multiple %96, 8 : i32
    %98 = arith.index_cast %97 : i32 to index
    %c0_36 = arith.constant 0 : index
    %99 = vector.load %arg13[%98, %c0_36] : memref<64x384xf32, #tpu.memory_space<vmem>>, vector<8x384xf32>
    %c0_37 = arith.constant 0 : index
    %c0_38 = arith.constant 0 : index
    %100 = vector.load %arg4[%c0_37, %c0_38] : memref<128x384xf32, #tpu.memory_space<vmem>>, vector<128x384xf32>
    %cst_39 = arith.constant dense<0.000000e+00> : vector<8x384xf32>
    %101 = tpu.matmul %95, %100, %cst_39 {dimension_numbers = #tpu.dot_dimension_numbers<[1], [0], [0], [1], [0, 0, 1, 1], [], []>} : vector<8x128xf32>, vector<128x384xf32>, vector<8x384xf32> -> vector<8x384xf32>
    %102 = vector.extract_strided_slice %99 {offsets = [0, 0], sizes = [8, 256], strides = [1, 1]} : vector<8x384xf32> to vector<8x256xf32>
    %103 = vector.extract_strided_slice %101 {offsets = [0, 0], sizes = [8, 256], strides = [1, 1]} : vector<8x384xf32> to vector<8x256xf32>
    %104 = arith.addf %102, %103 : vector<8x256xf32>
    %105 = arith.negf %104 : vector<8x256xf32>
    %106 = math.exp %105 : vector<8x256xf32>
    %cst_40 = arith.constant 1.000000e+00 : f32
    %107 = vector.broadcast %cst_40 : f32 to vector<8x256xf32>
    %108 = arith.addf %107, %106 : vector<8x256xf32>
    %109 = arith.divf %107, %108 : vector<8x256xf32>
    %110 = vector.extract_strided_slice %109 {offsets = [0, 0], sizes = [8, 128], strides = [1, 1]} : vector<8x256xf32> to vector<8x128xf32>
    %111 = vector.extract_strided_slice %109 {offsets = [0, 128], sizes = [8, 128], strides = [1, 1]} : vector<8x256xf32> to vector<8x128xf32>
    %112 = vector.extract_strided_slice %99 {offsets = [0, 256], sizes = [8, 128], strides = [1, 1]} : vector<8x384xf32> to vector<8x128xf32>
    %113 = vector.extract_strided_slice %101 {offsets = [0, 256], sizes = [8, 128], strides = [1, 1]} : vector<8x384xf32> to vector<8x128xf32>
    %c0_41 = arith.constant 0 : index
    %c0_42 = arith.constant 0 : index
    %114 = vector.load %arg5[%c0_41, %c0_42] : memref<1x128xf32, #tpu.memory_space<vmem>>, vector<1x128xf32>
    %115 = vector.broadcast %114 : vector<1x128xf32> to vector<8x128xf32>
    %116 = arith.addf %113, %115 : vector<8x128xf32>
    %117 = arith.mulf %110, %116 : vector<8x128xf32>
    %118 = arith.addf %112, %117 : vector<8x128xf32>
    %119 = math.tanh %118 : vector<8x128xf32>
    %cst_43 = arith.constant 1.000000e+00 : f32
    %120 = vector.broadcast %cst_43 : f32 to vector<8x128xf32>
    %121 = arith.subf %120, %111 : vector<8x128xf32>
    %122 = arith.mulf %121, %119 : vector<8x128xf32>
    %123 = arith.mulf %111, %95 : vector<8x128xf32>
    %124 = arith.addf %122, %123 : vector<8x128xf32>
    %c4_i32 = arith.constant 4 : i32
    %c8_i32_44 = arith.constant 8 : i32
    %125 = arith.muli %c4_i32, %c8_i32_44 : i32
    %126 = tpu.assume_multiple %125, 8 : i32
    %127 = arith.index_cast %126 : i32 to index
    %c0_45 = arith.constant 0 : index
    %128 = vector.load %arg13[%127, %c0_45] : memref<64x384xf32, #tpu.memory_space<vmem>>, vector<8x384xf32>
    %c0_46 = arith.constant 0 : index
    %c0_47 = arith.constant 0 : index
    %129 = vector.load %arg4[%c0_46, %c0_47] : memref<128x384xf32, #tpu.memory_space<vmem>>, vector<128x384xf32>
    %cst_48 = arith.constant dense<0.000000e+00> : vector<8x384xf32>
    %130 = tpu.matmul %124, %129, %cst_48 {dimension_numbers = #tpu.dot_dimension_numbers<[1], [0], [0], [1], [0, 0, 1, 1], [], []>} : vector<8x128xf32>, vector<128x384xf32>, vector<8x384xf32> -> vector<8x384xf32>
    %131 = vector.extract_strided_slice %128 {offsets = [0, 0], sizes = [8, 256], strides = [1, 1]} : vector<8x384xf32> to vector<8x256xf32>
    %132 = vector.extract_strided_slice %130 {offsets = [0, 0], sizes = [8, 256], strides = [1, 1]} : vector<8x384xf32> to vector<8x256xf32>
    %133 = arith.addf %131, %132 : vector<8x256xf32>
    %134 = arith.negf %133 : vector<8x256xf32>
    %135 = math.exp %134 : vector<8x256xf32>
    %cst_49 = arith.constant 1.000000e+00 : f32
    %136 = vector.broadcast %cst_49 : f32 to vector<8x256xf32>
    %137 = arith.addf %136, %135 : vector<8x256xf32>
    %138 = arith.divf %136, %137 : vector<8x256xf32>
    %139 = vector.extract_strided_slice %138 {offsets = [0, 0], sizes = [8, 128], strides = [1, 1]} : vector<8x256xf32> to vector<8x128xf32>
    %140 = vector.extract_strided_slice %138 {offsets = [0, 128], sizes = [8, 128], strides = [1, 1]} : vector<8x256xf32> to vector<8x128xf32>
    %141 = vector.extract_strided_slice %128 {offsets = [0, 256], sizes = [8, 128], strides = [1, 1]} : vector<8x384xf32> to vector<8x128xf32>
    %142 = vector.extract_strided_slice %130 {offsets = [0, 256], sizes = [8, 128], strides = [1, 1]} : vector<8x384xf32> to vector<8x128xf32>
    %c0_50 = arith.constant 0 : index
    %c0_51 = arith.constant 0 : index
    %143 = vector.load %arg5[%c0_50, %c0_51] : memref<1x128xf32, #tpu.memory_space<vmem>>, vector<1x128xf32>
    %144 = vector.broadcast %143 : vector<1x128xf32> to vector<8x128xf32>
    %145 = arith.addf %142, %144 : vector<8x128xf32>
    %146 = arith.mulf %139, %145 : vector<8x128xf32>
    %147 = arith.addf %141, %146 : vector<8x128xf32>
    %148 = math.tanh %147 : vector<8x128xf32>
    %cst_52 = arith.constant 1.000000e+00 : f32
    %149 = vector.broadcast %cst_52 : f32 to vector<8x128xf32>
    %150 = arith.subf %149, %140 : vector<8x128xf32>
    %151 = arith.mulf %150, %148 : vector<8x128xf32>
    %152 = arith.mulf %140, %124 : vector<8x128xf32>
    %153 = arith.addf %151, %152 : vector<8x128xf32>
    %c5_i32 = arith.constant 5 : i32
    %c8_i32_53 = arith.constant 8 : i32
    %154 = arith.muli %c5_i32, %c8_i32_53 : i32
    %155 = tpu.assume_multiple %154, 8 : i32
    %156 = arith.index_cast %155 : i32 to index
    %c0_54 = arith.constant 0 : index
    %157 = vector.load %arg13[%156, %c0_54] : memref<64x384xf32, #tpu.memory_space<vmem>>, vector<8x384xf32>
    %c0_55 = arith.constant 0 : index
    %c0_56 = arith.constant 0 : index
    %158 = vector.load %arg4[%c0_55, %c0_56] : memref<128x384xf32, #tpu.memory_space<vmem>>, vector<128x384xf32>
    %cst_57 = arith.constant dense<0.000000e+00> : vector<8x384xf32>
    %159 = tpu.matmul %153, %158, %cst_57 {dimension_numbers = #tpu.dot_dimension_numbers<[1], [0], [0], [1], [0, 0, 1, 1], [], []>} : vector<8x128xf32>, vector<128x384xf32>, vector<8x384xf32> -> vector<8x384xf32>
    %160 = vector.extract_strided_slice %157 {offsets = [0, 0], sizes = [8, 256], strides = [1, 1]} : vector<8x384xf32> to vector<8x256xf32>
    %161 = vector.extract_strided_slice %159 {offsets = [0, 0], sizes = [8, 256], strides = [1, 1]} : vector<8x384xf32> to vector<8x256xf32>
    %162 = arith.addf %160, %161 : vector<8x256xf32>
    %163 = arith.negf %162 : vector<8x256xf32>
    %164 = math.exp %163 : vector<8x256xf32>
    %cst_58 = arith.constant 1.000000e+00 : f32
    %165 = vector.broadcast %cst_58 : f32 to vector<8x256xf32>
    %166 = arith.addf %165, %164 : vector<8x256xf32>
    %167 = arith.divf %165, %166 : vector<8x256xf32>
    %168 = vector.extract_strided_slice %167 {offsets = [0, 0], sizes = [8, 128], strides = [1, 1]} : vector<8x256xf32> to vector<8x128xf32>
    %169 = vector.extract_strided_slice %167 {offsets = [0, 128], sizes = [8, 128], strides = [1, 1]} : vector<8x256xf32> to vector<8x128xf32>
    %170 = vector.extract_strided_slice %157 {offsets = [0, 256], sizes = [8, 128], strides = [1, 1]} : vector<8x384xf32> to vector<8x128xf32>
    %171 = vector.extract_strided_slice %159 {offsets = [0, 256], sizes = [8, 128], strides = [1, 1]} : vector<8x384xf32> to vector<8x128xf32>
    %c0_59 = arith.constant 0 : index
    %c0_60 = arith.constant 0 : index
    %172 = vector.load %arg5[%c0_59, %c0_60] : memref<1x128xf32, #tpu.memory_space<vmem>>, vector<1x128xf32>
    %173 = vector.broadcast %172 : vector<1x128xf32> to vector<8x128xf32>
    %174 = arith.addf %171, %173 : vector<8x128xf32>
    %175 = arith.mulf %168, %174 : vector<8x128xf32>
    %176 = arith.addf %170, %175 : vector<8x128xf32>
    %177 = math.tanh %176 : vector<8x128xf32>
    %cst_61 = arith.constant 1.000000e+00 : f32
    %178 = vector.broadcast %cst_61 : f32 to vector<8x128xf32>
    %179 = arith.subf %178, %169 : vector<8x128xf32>
    %180 = arith.mulf %179, %177 : vector<8x128xf32>
    %181 = arith.mulf %169, %153 : vector<8x128xf32>
    %182 = arith.addf %180, %181 : vector<8x128xf32>
    %c6_i32 = arith.constant 6 : i32
    %c8_i32_62 = arith.constant 8 : i32
    %183 = arith.muli %c6_i32, %c8_i32_62 : i32
    %184 = tpu.assume_multiple %183, 8 : i32
    %185 = arith.index_cast %184 : i32 to index
    %c0_63 = arith.constant 0 : index
    %186 = vector.load %arg13[%185, %c0_63] : memref<64x384xf32, #tpu.memory_space<vmem>>, vector<8x384xf32>
    %c0_64 = arith.constant 0 : index
    %c0_65 = arith.constant 0 : index
    %187 = vector.load %arg4[%c0_64, %c0_65] : memref<128x384xf32, #tpu.memory_space<vmem>>, vector<128x384xf32>
    %cst_66 = arith.constant dense<0.000000e+00> : vector<8x384xf32>
    %188 = tpu.matmul %182, %187, %cst_66 {dimension_numbers = #tpu.dot_dimension_numbers<[1], [0], [0], [1], [0, 0, 1, 1], [], []>} : vector<8x128xf32>, vector<128x384xf32>, vector<8x384xf32> -> vector<8x384xf32>
    %189 = vector.extract_strided_slice %186 {offsets = [0, 0], sizes = [8, 256], strides = [1, 1]} : vector<8x384xf32> to vector<8x256xf32>
    %190 = vector.extract_strided_slice %188 {offsets = [0, 0], sizes = [8, 256], strides = [1, 1]} : vector<8x384xf32> to vector<8x256xf32>
    %191 = arith.addf %189, %190 : vector<8x256xf32>
    %192 = arith.negf %191 : vector<8x256xf32>
    %193 = math.exp %192 : vector<8x256xf32>
    %cst_67 = arith.constant 1.000000e+00 : f32
    %194 = vector.broadcast %cst_67 : f32 to vector<8x256xf32>
    %195 = arith.addf %194, %193 : vector<8x256xf32>
    %196 = arith.divf %194, %195 : vector<8x256xf32>
    %197 = vector.extract_strided_slice %196 {offsets = [0, 0], sizes = [8, 128], strides = [1, 1]} : vector<8x256xf32> to vector<8x128xf32>
    %198 = vector.extract_strided_slice %196 {offsets = [0, 128], sizes = [8, 128], strides = [1, 1]} : vector<8x256xf32> to vector<8x128xf32>
    %199 = vector.extract_strided_slice %186 {offsets = [0, 256], sizes = [8, 128], strides = [1, 1]} : vector<8x384xf32> to vector<8x128xf32>
    %200 = vector.extract_strided_slice %188 {offsets = [0, 256], sizes = [8, 128], strides = [1, 1]} : vector<8x384xf32> to vector<8x128xf32>
    %c0_68 = arith.constant 0 : index
    %c0_69 = arith.constant 0 : index
    %201 = vector.load %arg5[%c0_68, %c0_69] : memref<1x128xf32, #tpu.memory_space<vmem>>, vector<1x128xf32>
    %202 = vector.broadcast %201 : vector<1x128xf32> to vector<8x128xf32>
    %203 = arith.addf %200, %202 : vector<8x128xf32>
    %204 = arith.mulf %197, %203 : vector<8x128xf32>
    %205 = arith.addf %199, %204 : vector<8x128xf32>
    %206 = math.tanh %205 : vector<8x128xf32>
    %cst_70 = arith.constant 1.000000e+00 : f32
    %207 = vector.broadcast %cst_70 : f32 to vector<8x128xf32>
    %208 = arith.subf %207, %198 : vector<8x128xf32>
    %209 = arith.mulf %208, %206 : vector<8x128xf32>
    %210 = arith.mulf %198, %182 : vector<8x128xf32>
    %211 = arith.addf %209, %210 : vector<8x128xf32>
    %c7_i32 = arith.constant 7 : i32
    %c8_i32_71 = arith.constant 8 : i32
    %212 = arith.muli %c7_i32, %c8_i32_71 : i32
    %213 = tpu.assume_multiple %212, 8 : i32
    %214 = arith.index_cast %213 : i32 to index
    %c0_72 = arith.constant 0 : index
    %215 = vector.load %arg13[%214, %c0_72] : memref<64x384xf32, #tpu.memory_space<vmem>>, vector<8x384xf32>
    %c0_73 = arith.constant 0 : index
    %c0_74 = arith.constant 0 : index
    %216 = vector.load %arg4[%c0_73, %c0_74] : memref<128x384xf32, #tpu.memory_space<vmem>>, vector<128x384xf32>
    %cst_75 = arith.constant dense<0.000000e+00> : vector<8x384xf32>
    %217 = tpu.matmul %211, %216, %cst_75 {dimension_numbers = #tpu.dot_dimension_numbers<[1], [0], [0], [1], [0, 0, 1, 1], [], []>} : vector<8x128xf32>, vector<128x384xf32>, vector<8x384xf32> -> vector<8x384xf32>
    %218 = vector.extract_strided_slice %215 {offsets = [0, 0], sizes = [8, 256], strides = [1, 1]} : vector<8x384xf32> to vector<8x256xf32>
    %219 = vector.extract_strided_slice %217 {offsets = [0, 0], sizes = [8, 256], strides = [1, 1]} : vector<8x384xf32> to vector<8x256xf32>
    %220 = arith.addf %218, %219 : vector<8x256xf32>
    %221 = arith.negf %220 : vector<8x256xf32>
    %222 = math.exp %221 : vector<8x256xf32>
    %cst_76 = arith.constant 1.000000e+00 : f32
    %223 = vector.broadcast %cst_76 : f32 to vector<8x256xf32>
    %224 = arith.addf %223, %222 : vector<8x256xf32>
    %225 = arith.divf %223, %224 : vector<8x256xf32>
    %226 = vector.extract_strided_slice %225 {offsets = [0, 0], sizes = [8, 128], strides = [1, 1]} : vector<8x256xf32> to vector<8x128xf32>
    %227 = vector.extract_strided_slice %225 {offsets = [0, 128], sizes = [8, 128], strides = [1, 1]} : vector<8x256xf32> to vector<8x128xf32>
    %228 = vector.extract_strided_slice %215 {offsets = [0, 256], sizes = [8, 128], strides = [1, 1]} : vector<8x384xf32> to vector<8x128xf32>
    %229 = vector.extract_strided_slice %217 {offsets = [0, 256], sizes = [8, 128], strides = [1, 1]} : vector<8x384xf32> to vector<8x128xf32>
    %c0_77 = arith.constant 0 : index
    %c0_78 = arith.constant 0 : index
    %230 = vector.load %arg5[%c0_77, %c0_78] : memref<1x128xf32, #tpu.memory_space<vmem>>, vector<1x128xf32>
    %231 = vector.broadcast %230 : vector<1x128xf32> to vector<8x128xf32>
    %232 = arith.addf %229, %231 : vector<8x128xf32>
    %233 = arith.mulf %226, %232 : vector<8x128xf32>
    %234 = arith.addf %228, %233 : vector<8x128xf32>
    %235 = math.tanh %234 : vector<8x128xf32>
    %cst_79 = arith.constant 1.000000e+00 : f32
    %236 = vector.broadcast %cst_79 : f32 to vector<8x128xf32>
    %237 = arith.subf %236, %227 : vector<8x128xf32>
    %238 = arith.mulf %237, %235 : vector<8x128xf32>
    %239 = arith.mulf %227, %211 : vector<8x128xf32>
    %240 = arith.addf %238, %239 : vector<8x128xf32>
    %c8_i32_80 = arith.constant 8 : i32
    %c0_81 = arith.constant 0 : index
    %c56 = arith.constant 56 : index
    %c0_82 = arith.constant 0 : index
    %241 = vector.load %arg1[%c0_81, %c56, %c0_82] : memref<1x64x32xf32, #tpu.memory_space<vmem>>, vector<1x8x32xf32>
    %242 = vector.shape_cast %241 : vector<1x8x32xf32> to vector<8x32xf32>
    %c0_83 = arith.constant 0 : index
    %c0_84 = arith.constant 0 : index
    %243 = vector.load %arg6[%c0_83, %c0_84] : memref<32x384xf32, #tpu.memory_space<vmem>>, vector<32x384xf32>
    %cst_85 = arith.constant dense<0.000000e+00> : vector<8x384xf32>
    %244 = tpu.matmul %242, %243, %cst_85 {dimension_numbers = #tpu.dot_dimension_numbers<[1], [0], [0], [1], [0, 0, 1, 1], [], []>} : vector<8x32xf32>, vector<32x384xf32>, vector<8x384xf32> -> vector<8x384xf32>
    %c0_86 = arith.constant 0 : index
    %c0_87 = arith.constant 0 : index
    %245 = vector.load %arg7[%c0_86, %c0_87] : memref<1x384xf32, #tpu.memory_space<vmem>>, vector<1x384xf32>
    %246 = vector.broadcast %245 : vector<1x384xf32> to vector<8x384xf32>
    %247 = arith.addf %244, %246 : vector<8x384xf32>
    %248 = vector.extract_strided_slice %247 {offsets = [0, 0], sizes = [8, 256], strides = [1, 1]} : vector<8x384xf32> to vector<8x256xf32>
    %249 = arith.negf %248 : vector<8x256xf32>
    %250 = math.exp %249 : vector<8x256xf32>
    %cst_88 = arith.constant 1.000000e+00 : f32
    %251 = vector.broadcast %cst_88 : f32 to vector<8x256xf32>
    %252 = arith.addf %251, %250 : vector<8x256xf32>
    %253 = arith.divf %251, %252 : vector<8x256xf32>
    %254 = vector.extract_strided_slice %253 {offsets = [0, 128], sizes = [8, 128], strides = [1, 1]} : vector<8x256xf32> to vector<8x128xf32>
    %255 = vector.extract_strided_slice %247 {offsets = [0, 256], sizes = [8, 128], strides = [1, 1]} : vector<8x384xf32> to vector<8x128xf32>
    %256 = vector.extract_strided_slice %253 {offsets = [0, 0], sizes = [8, 128], strides = [1, 1]} : vector<8x256xf32> to vector<8x128xf32>
    %c0_89 = arith.constant 0 : index
    %c0_90 = arith.constant 0 : index
    %257 = vector.load %arg8[%c0_89, %c0_90] : memref<1x128xf32, #tpu.memory_space<vmem>>, vector<1x128xf32>
    %258 = vector.broadcast %257 : vector<1x128xf32> to vector<8x128xf32>
    %259 = arith.mulf %256, %258 : vector<8x128xf32>
    %260 = arith.addf %255, %259 : vector<8x128xf32>
    %261 = math.tanh %260 : vector<8x128xf32>
    %cst_91 = arith.constant 1.000000e+00 : f32
    %262 = vector.broadcast %cst_91 : f32 to vector<8x128xf32>
    %263 = arith.subf %262, %254 : vector<8x128xf32>
    %264 = arith.mulf %263, %261 : vector<8x128xf32>
    %c0_92 = arith.constant 0 : index
    %c0_93 = arith.constant 0 : index
    %265 = vector.load %arg9[%c0_92, %c0_93] : memref<128x128xf32, #tpu.memory_space<vmem>>, vector<128x128xf32>
    %cst_94 = arith.constant dense<0.000000e+00> : vector<8x128xf32>
    %266 = tpu.matmul %240, %265, %cst_94 {dimension_numbers = #tpu.dot_dimension_numbers<[1], [0], [0], [1], [0, 0, 1, 1], [], []>} : vector<8x128xf32>, vector<128x128xf32>, vector<8x128xf32> -> vector<8x128xf32>
    %c0_95 = arith.constant 0 : index
    %c0_96 = arith.constant 0 : index
    %267 = vector.load %arg10[%c0_95, %c0_96] : memref<128x128xf32, #tpu.memory_space<vmem>>, vector<128x128xf32>
    %cst_97 = arith.constant dense<0.000000e+00> : vector<8x128xf32>
    %268 = tpu.matmul %264, %267, %cst_97 {dimension_numbers = #tpu.dot_dimension_numbers<[1], [0], [0], [1], [0, 0, 1, 1], [], []>} : vector<8x128xf32>, vector<128x128xf32>, vector<8x128xf32> -> vector<8x128xf32>
    %269 = arith.addf %266, %268 : vector<8x128xf32>
    %c0_98 = arith.constant 0 : index
    %c0_99 = arith.constant 0 : index
    %270 = vector.load %arg11[%c0_98, %c0_99] : memref<1x128xf32, #tpu.memory_space<vmem>>, vector<1x128xf32>
    %271 = vector.broadcast %270 : vector<1x128xf32> to vector<8x128xf32>
    %272 = arith.addf %269, %271 : vector<8x128xf32>
    %c0_100 = arith.constant 0 : index
    %c0_101 = arith.constant 0 : index
    %273 = vector.load %arg12[%c0_100, %c0_101] : memref<8x128xf32, #tpu.memory_space<vmem>>, vector<8x128xf32>
    tpu.vector_store %arg12[%c0_100, %c0_101], %272 {strides = array<i32>} : memref<8x128xf32, #tpu.memory_space<vmem>>, vector<8x128xf32>,
    return
  }
  func.func @transform_0(%arg0: i32) -> (i32, i32, i32) {
    %c0_i32 = arith.constant 0 : i32
    %c0_i32_0 = arith.constant 0 : i32
    %c0_i32_1 = arith.constant 0 : i32
    return %arg0, %c0_i32, %c0_i32_0 : i32, i32, i32
  }
  func.func @transform_1(%arg0: i32) -> (i32, i32) {
    %c0_i32 = arith.constant 0 : i32
    %c0_i32_0 = arith.constant 0 : i32
    %c0_i32_1 = arith.constant 0 : i32
    return %c0_i32, %c0_i32_0 : i32, i32
  }
  func.func @transform_2(%arg0: i32) -> (i32, i32) {
    %c0_i32 = arith.constant 0 : i32
    %c0_i32_0 = arith.constant 0 : i32
    %c0_i32_1 = arith.constant 0 : i32
    return %c0_i32, %c0_i32_0 : i32, i32
  }
  func.func @transform_3(%arg0: i32) -> (i32, i32) {
    %c0_i32 = arith.constant 0 : i32
    %c0_i32_0 = arith.constant 0 : i32
    %c0_i32_1 = arith.constant 0 : i32
    return %c0_i32, %c0_i32_0 : i32, i32
  }
  func.func @transform_4(%arg0: i32) -> (i32, i32) {
    %c0_i32 = arith.constant 0 : i32
    %c0_i32_0 = arith.constant 0 : i32
    %c0_i32_1 = arith.constant 0 : i32
    return %c0_i32, %c0_i32_0 : i32, i32
  }
  func.func @transform_5(%arg0: i32) -> (i32, i32) {
    %c0_i32 = arith.constant 0 : i32
    %c0_i32_0 = arith.constant 0 : i32
    %c0_i32_1 = arith.constant 0 : i32
    return %c0_i32, %c0_i32_0 : i32, i32
  }
  func.func @transform_6(%arg0: i32) -> (i32, i32) {
    %c0_i32 = arith.constant 0 : i32
    %c0_i32_0 = arith.constant 0 : i32
    %c0_i32_1 = arith.constant 0 : i32
    return %c0_i32, %c0_i32_0 : i32, i32
  }
  func.func @transform_7(%arg0: i32) -> (i32, i32) {
    %c0_i32 = arith.constant 0 : i32
    %c0_i32_0 = arith.constant 0 : i32
    %c0_i32_1 = arith.constant 0 : i32
    return %c0_i32, %c0_i32_0 : i32, i32
  }
  func.func @transform_8(%arg0: i32) -> (i32, i32) {
    %c0_i32 = arith.constant 0 : i32
    %c0_i32_0 = arith.constant 0 : i32
    %c0_i32_1 = arith.constant 0 : i32
    return %c0_i32, %c0_i32_0 : i32, i32
  }
  func.func @transform_9(%arg0: i32) -> (i32, i32) {
    %c0_i32 = arith.constant 0 : i32
    %c0_i32_0 = arith.constant 0 : i32
    %c0_i32_1 = arith.constant 0 : i32
    return %c0_i32, %c0_i32_0 : i32, i32
  }
  func.func @transform_10(%arg0: i32) -> (i32, i32) {
    %c0_i32 = arith.constant 0 : i32
    %c0_i32_0 = arith.constant 0 : i32
    %c0_i32_1 = arith.constant 0 : i32
    return %c0_i32, %c0_i32_0 : i32, i32
  }
  func.func @transform_11(%arg0: i32) -> (i32, i32) {
    %c0_i32 = arith.constant 0 : i32
    %c0_i32_0 = arith.constant 0 : i32
    return %arg0, %c0_i32 : i32, i32
  }
}

</mosaic_0001>

<bundles_post_ra>
// kernel: tpu_custom_call.1
= control target key start
LH: loop header
LB: loop body
LE: loop exit
PB: predicated region body
PF: predicated region fallthrough
CT: control target
= control target key end

     0   :  { %16 = vsyncpa [#allocation4], 0  ;;  %s2850_s0 = inlined_call_operand.vmem [shape: f32[1,64,32], index: 0, kind: input, shape index: {}]   ;;  %s2851_s1 = inlined_call_operand.vmem [shape: f32[32,384], index: 1, kind: input, shape index: {}]   ;;  %s2852_s2 = inlined_call_operand.hbm [shape: f32[1,384], index: 2, kind: input, shape index: {}]   ;;  %s2853_s3 = inlined_call_operand.hbm [shape: f32[128,384], index: 3, kind: input, shape index: {}]   ;;  %s2854_s4 = inlined_call_operand.hbm [shape: f32[1,128], index: 4, kind: input, shape index: {}]   ;;  %s2855_s5 = inlined_call_operand.hbm [shape: f32[32,384], index: 5, kind: input, shape index: {}]   ;;  %s2856_s6 = inlined_call_operand.vmem [shape: f32[1,384], index: 6, kind: input, shape index: {}]   ;;  %s2857_s7 = inlined_call_operand.vmem [shape: f32[1,128], index: 7, kind: input, shape index: {}]   ;;  %s2858_s8 = inlined_call_operand.hbm [shape: f32[128,128], index: 8, kind: input, shape index: {}]   ;;  %s2859_s9 = inlined_call_operand.hbm [shape: f32[128,128], index: 9, kind: input, shape index: {}]   ;;  %s2860_s10 = inlined_call_operand.vmem [shape: f32[1,128], index: 10, kind: input, shape index: {}]   ;;  %s2861_s11 = inlined_call_operand.hbm [shape: f32[8,128], index: 11, kind: output, shape index: {}]  }
   0x1   :  { %17 = vsyncpa [#allocation7], 0 }
   0x2   :  { %18 = vsyncpa [#allocation10], 0 }
   0x3   :  { %19 = vsyncpa [#allocation13], 0  ;;  %s40_s19 = sshll.u32 %s2853_s3, 4  ;;  %s41_s19 = int_to_ptr.hbm [resolvable:$true] %s40_s19 }
   0x4   :  { %20 = vsyncpa [#allocation5], 0  ;;  %s1906_s20 = smov [#allocation6]   ;;  %s64_s24 = sshll.u32 %s2855_s5, 4  ;;  %s65_s24 = int_to_ptr.hbm [resolvable:$true] %s64_s24 }
   0x5   :  { %s42_s21 = sshll.u32 %s1906_s20, 4  ;;  %s1907_s25 = smov 384   ;;  %s43_s21 = int_to_ptr.vmem [resolvable:$true] %s42_s21 }
   0x6   :  { %s1908_s26 = smov 24   ;;  %s1909_s27 = smov [#allocation9]  }
   0x7   :  { %48 = dma.hbm_to_vmem [thread:$0]  %s41_s19, 6144, %s43_s21, [#allocation7], %s1907_s25, %s1907_s25, %s1908_s26  }
   0x8   :  { %s66_s28 = sshll.u32 %s1909_s27, 4  ;;  %s30_s12 = sshll.u32 %s2852_s2, 4  ;;  %s67_s28 = int_to_ptr.vmem [resolvable:$true] %s66_s28  ;;  %s31_s12 = int_to_ptr.hbm [resolvable:$true] %s30_s12 }
   0x9   :  { %72 = dma.hbm_to_vmem [thread:$0]  %s65_s24, 1536, %s67_s28, [#allocation10], %s1907_s25, %s1907_s25, %s1908_s26  }
   0xa   :  { %s54_s14 = sshll.u32 %s2854_s4, 4  ;;  %s1910_s15 = smov [#allocation3]   ;;  %s55_s14 = int_to_ptr.hbm [resolvable:$true] %s54_s14 }
   0xb   :  { %s32_s16 = sshll.u32 %s1910_s15, 4  ;;  %s1911_s5 = smov [#allocation8]   ;;  %s33_s16 = int_to_ptr.vmem [resolvable:$true] %s32_s16 }
   0xc   :  { %35 = dma.hbm_to_vmem [thread:$0]  %s31_s12, 48, %s33_s16, [#allocation4]  }
   0xd   :  { %s56_s17 = sshll.u32 %s1911_s5, 4  ;;  %s81_s20 = sshll.u32 %s2858_s8, 4  ;;  %s57_s17 = int_to_ptr.vmem [resolvable:$true] %s56_s17  ;;  %s82_s20 = int_to_ptr.hbm [resolvable:$true] %s81_s20 }
   0xe   :  { %59 = dma.hbm_to_vmem [thread:$0]  %s55_s14, 16, %s57_s17, [#allocation7]  }
   0xf   :  { %s1912_s2 = smov [#allocation11]   ;;  %s94_s4 = sshll.u32 %s2859_s9, 4  ;;  %s95_s4 = int_to_ptr.hbm [resolvable:$true] %s94_s4 }
  0x10   :  { %s83_s21 = sshll.u32 %s1912_s2, 4  ;;  %s1913_s24 = smov 128   ;;  %s84_s21 = int_to_ptr.vmem [resolvable:$true] %s83_s21 }
  0x11   :  { %s1914_s25 = smov 8   ;;  %s1915_s26 = smov [#allocation12]  }
  0x12   :  { %89 = dma.hbm_to_vmem [thread:$0]  %s82_s20, 2048, %s84_s21, [#allocation10], %s1913_s24, %s1913_s24, %s1914_s25  }
  0x13   :  { %s96_s27 = sshll.u32 %s1915_s26, 4  ;;  %s97_s27 = int_to_ptr.vmem [resolvable:$true] %s96_s27 }
  0x14   :  { %102 = dma.hbm_to_vmem [thread:$0]  %s95_s4, 2048, %s97_s27, [#allocation13], %s1913_s24, %s1913_s24, %s1914_s25  }
  0x15   :  { %1896 = dma.done.wait [#allocation4], 48  }
  0x16   :  { %1897 = vsyncadd [#allocation4], 4294967248 }
  0x17   :  { %1898 = dma.done.wait [#allocation7], 6160  }
  0x18   :  { %1899 = vsyncadd [#allocation7], 4294961136 }
  0x19   :  { %1900 = dma.done.wait [#allocation10], 3584  }
  0x1a   :  { %1901 = vsyncadd [#allocation10], 4294963712 }
  0x1b   :  { %1902 = dma.done.wait [#allocation13], 2048  }
  0x1c   :  { %1903 = vsyncadd [#allocation13], 4294965248  ;;  %v146_v0 = vld [vmem:[%s2851_s1 + $0x48] sm:$0xff]  ;;  %v143_v2 = vld [vmem:[%s2851_s1 + $0x30] sm:$0xff]  ;;  %vm157_vm0 = vcmask 261120   ;;  %v1916_v41 = vmov 0.0  }
  0x1d   :  { %v1999_v1 = vld [vmem:[#allocation6 + $0x168] sm:$0xff]  ;;  %194 = vmatpush.msra.mxu0 %v146_v0  ;;  %v2005_v3 = vld [vmem:[#allocation6 + $0x150] sm:$0xff]  ;;  %v2010_v5 = vld [vmem:[#allocation6 + $0x138] sm:$0xff]  ;;  %s1917_s23 = smov [#allocation14]   ;;  %s1509_s26 = sshll.u32 %s2861_s11, 4  ;;  %s1510_s26 = int_to_ptr.hbm [resolvable:$true] %s1509_s26 }
  0x1e   :  { %383 = vmatpush.msra.mxu3 %v1999_v1  ;;  %v140_v4 = vld [vmem:[%s2851_s1 + $0x18] sm:$0xff]  ;;  %v137_v6 = vld [vmem:[%s2851_s1] sm:$0xff]  ;;  %v2024_v9 = vld [vmem:[#allocation6 + $0x108] sm:$0xff]  ;;  %s1507_s4 = sshll.u32 %s1917_s23, 4  ;;  %s1508_s4 = int_to_ptr.vmem [resolvable:$true] %s1507_s4 }
  0x1f   :  { %195 = vmatpush.msra.mxu0 %v143_v2  ;;  %v2016_v7 = vld [vmem:[#allocation6 + $0x120] sm:$0xff]  ;;  %v2026_v10 = vld [vmem:[#allocation6 + $0x178] sm:$0xff]  ;;  %v2031_v11 = vld [vmem:[#allocation6 + $0xf0] sm:$0xff] }
  0x20   :  { %384 = vmatpush.msra.mxu3 %v2005_v3  ;;  %v2022_v8 = vld [vmem:[%s2850_s0] sm:$0xff]  ;;  %v2039_v14 = vld [vmem:[#allocation6 + $0x148] sm:$0xff]  ;;  %v2045_v16 = vld [vmem:[#allocation6 + $0x130] sm:$0xff] }
  0x21   :  { %196 = vmatpush.msra.mxu0 %v140_v4  ;;  %v2033_v12 = vld [vmem:[#allocation6 + $0x160] sm:$0xff]  ;;  %v2037_v13 = vld [vmem:[#allocation6 + $0xd8] sm:$0xff]  ;;  %v2054_v18 = vld [vmem:[#allocation6 + $0xa8] sm:$0xff] }
  0x22   :  { %385 = vmatpush.msra.mxu3 %v2010_v5  ;;  %v2042_v15 = vld [vmem:[#allocation6 + $0xc0] sm:$0xff]  ;;  %v2056_v19 = vld [vmem:[#allocation6 + $0x118] sm:$0xff]  ;;  %v2062_v20 = vld [vmem:[#allocation6 + $0x90] sm:$0xff] }
  0x23   :  { %197 = vmatpush.msra.mxu0 %v137_v6  ;;  %v2051_v17 = vld [vmem:[%s2850_s0 + $0x8] sm:$0xff]  ;;  %v2068_v22 = vld [vmem:[#allocation6 + $0x78] sm:$0xff]  ;;  %v2080_v25 = vld [vmem:[%s2850_s0 + $0x10] sm:$0xff] }
  0x24   :  { %386 = vmatpush.msra.mxu3 %v2016_v7  ;;  %1529 = vmatmul.msk.f32.vlgmr.msra.gmra.mxu0 %vm157_vm0, %v2022_v8  ;;  %v2064_v21 = vld [vmem:[#allocation6 + $0x100] sm:$0xff]  ;;  %v2070_v23 = vld [vmem:[#allocation6 + $0xe8] sm:$0xff]  ;;  %v2083_v26 = vld [vmem:[#allocation6 + $0xd0] sm:$0xff] }
  0x25   :  { %423 = vmatpush.msrb.mxu0 %v2026_v10  ;;  %v2074_v24 = vld [vmem:[#allocation6 + $0x60] sm:$0xff]  ;;  %v2085_v27 = vld [vmem:[#allocation6 + $0x48] sm:$0xff]  ;;  %v2091_v28 = vld [vmem:[#allocation6 + $0x30] sm:$0xff] }
  0x26   :  { %387 = vmatpush.msra.mxu3 %v2024_v9  ;;  %2882 = vst [vmem:[#allocation20_spill] sm:$0xff] %v2091_v28  ;;  %v2094_v29 = vld [vmem:[#allocation6 + $0xb8] sm:$0xff]  ;;  %v2100_v31 = vld [vmem:[#allocation6 + $0xa0] sm:$0xff]  ;;  %v147_v32 = vld [vmem:[%s2851_s1 + $0x50] sm:$0xff] }
  0x27   :  { %424 = vmatpush.msrb.mxu0 %v2033_v12  ;;  %v2096_v30 = vld [vmem:[#allocation6 + $0x18] sm:$0xff]  ;;  %v2105_v33 = vld [vmem:[#allocation6] sm:$0xff]  ;;  %235 = vmatpush.msra.mxu1 %v147_v32  ;;  %v2117_v36 = vld [vmem:[#allocation6 + $0x88] sm:$0xff] }
  0x28   :  { %388 = vmatpush.msra.mxu3 %v2031_v11  ;;  %2883 = vst [vmem:[#allocation21_spill] sm:$0xff] %v2096_v30  ;;  %v2110_v34 = vld [vmem:[%s2850_s0 + $0x18] sm:$0xff]  ;;  %v145_v39 = vld [vmem:[%s2851_s1 + $0x40] sm:$0xff]  ;;  %v142_v44 = vld [vmem:[%s2851_s1 + $0x28] sm:$0xff] }
  0x29   :  { %425 = vmatpush.msrb.mxu0 %v2039_v14  ;;  %2884 = vst [vmem:[#allocation22_spill] sm:$0xff] %v2105_v33  ;;  %v148_v35 = vld [vmem:[%s2851_s1 + $0x58] sm:$0xff]  ;;  %v141_v43 = vld [vmem:[%s2851_s1 + $0x20] sm:$0xff]  ;;  %v138_v46 = vld [vmem:[%s2851_s1 + $0x8] sm:$0xff] }
  0x2a   :  { %389 = vmatpush.msra.mxu3 %v2037_v13  ;;  %v144_v37 = vld [vmem:[%s2851_s1 + $0x38] sm:$0xff]  ;;  %276 = vmatpush.msra.mxu2 %v148_v35  ;;  %v2148_v47 = vld [vmem:[#allocation6 + $0x140] sm:$0xff]  ;;  %v139_v48 = vld [vmem:[%s2851_s1 + $0x10] sm:$0xff] }
  0x2b   :  { %426 = vmatpush.msrb.mxu0 %v2045_v16  ;;  %v2122_v38 = vld [vmem:[#allocation6 + $0x170] sm:$0xff]  ;;  %236 = vmatpush.msra.mxu1 %v144_v37  ;;  %v2134_v42 = vld [vmem:[#allocation6 + $0x158] sm:$0xff]  ;;  %v2155_v49 = vld [vmem:[#allocation6 + $0x40] sm:$0xff] }
  0x2c   :  { %390 = vmatpush.msra.mxu3 %v2042_v15  ;;  %1530 = vmatmul.msk.f32.gmra.mxu0 %vm157_vm0, %v2051_v17  ;;  %v2129_v40 = vld [vmem:[#allocation6 + $0x70] sm:$0xff]  ;;  %v2143_v45 = vld [vmem:[#allocation6 + $0x58] sm:$0xff]  ;;  %2885 = vst [vmem:[#allocation23_spill] sm:$0xff] %v2155_v49  ;;  %v2157_v50 = vld [vmem:[#allocation6 + $0x128] sm:$0xff] }
  0x2d   :  { %427 = vmatpush.msrb.mxu0 %v2056_v19  ;;  %277 = vmatpush.msra.mxu2 %v145_v39  ;;  %v2164_v51 = vld [vmem:[%s2850_s0 + $0x20] sm:$0xff]  ;;  %v2168_v52 = vld [vmem:[#allocation6 + $0x110] sm:$0xff]  ;;  %v2171_v53 = vld [vmem:[#allocation6 + $0x28] sm:$0xff] }
  0x2e   :  { %391 = vmatpush.msra.mxu3 %v2054_v18  ;;  %237 = vmatpush.msra.mxu1 %v141_v43  ;;  %2886 = vst [vmem:[#allocation24_spill] sm:$0xff] %v2171_v53  ;;  %v2178_v54 = vld [vmem:[#allocation6 + $0xf8] sm:$0xff]  ;;  %v2180_v55 = vld [vmem:[#allocation6 + $0x10] sm:$0xff]  ;;  %v2185_v56 = vld [vmem:[#allocation6 + $0xe0] sm:$0xff] }
  0x2f   :  { %428 = vmatpush.msrb.mxu0 %v2064_v21  ;;  %278 = vmatpush.msra.mxu2 %v142_v44  ;;  %2887 = vst [vmem:[#allocation25_spill] sm:$0xff] %v2180_v55  ;;  %v2191_v57 = vld [vmem:[#allocation6 + $0xc8] sm:$0xff]  ;;  %v2203_v59 = vld [vmem:[#allocation6 + $0xb0] sm:$0xff]  ;;  %v2212_v60 = vld [vmem:[#allocation6 + $0x98] sm:$0xff] }
  0x30   :  { %392 = vmatpush.msra.mxu3 %v2062_v20  ;;  %238 = vmatpush.msra.mxu1 %v138_v46  ;;  %v2199_v58 = vld [vmem:[%s2850_s0 + $0x28] sm:$0xff]  ;;  %v2231_v63 = vld [vmem:[%s2850_s0 + $0x30] sm:$0xff]  ;;  %v2244_v2 = vld [vmem:[#allocation6 + $0x38] sm:$0xff] }
  0x31   :  { %429 = vmatpush.msrb.mxu0 %v2070_v23  ;;  %1537 = vmatmul.msk.f32.vlgmr.msra.gmra.mxu1 %vm157_vm0, %v2022_v8  ;;  %v2217_v61 = vld [vmem:[#allocation6 + $0x80] sm:$0xff]  ;;  %v2223_v62 = vld [vmem:[#allocation6 + $0x68] sm:$0xff]  ;;  %v2235_v0 = vld [vmem:[#allocation6 + $0x50] sm:$0xff]  ;;  %2889 = vst [vmem:[#allocation27_spill] sm:$0xff] %v2244_v2 }
  0x32   :  { %393 = vmatpush.msra.mxu3 %v2068_v22  ;;  %279 = vmatpush.msra.mxu2 %v139_v48  ;;  %2888 = vst [vmem:[#allocation26_spill] sm:$0xff] %v2235_v0  ;;  %v2249_v4 = vld [vmem:[#allocation6 + $0x20] sm:$0xff]  ;;  %v2255_v6 = vld [vmem:[#allocation6 + $0x8] sm:$0xff] }
  0x33   :  { %430 = vmatpush.msrb.mxu0 %v2083_v26  ;;  %1545 = vmatmul.msk.f32.vlgmr.msra.gmra.mxu2 %vm157_vm0, %v2022_v8  ;;  %2890 = vst [vmem:[#allocation28_spill] sm:$0xff] %v2249_v4  ;;  %v2263_v8 = vld [vmem:[%s2850_s0 + $0x38] sm:$0xff] }
  0x34   :  { %394 = vmatpush.msra.mxu3 %v2074_v24  ;;  %1531 = vmatmul.msk.f32.gmra.mxu0 %vm157_vm0, %v2080_v25  ;;  %2891 = vst [vmem:[#allocation29_spill] sm:$0xff] %v2255_v6 }
  0x35   :  { %431 = vmatpush.msrb.mxu0 %v2094_v29  ;;  %501 = vmatpush.msrb.mxu1 %v1999_v1 }
  0x36   :  { %395 = vmatpush.msra.mxu3 %v2085_v27  ;;  %521 = vmatpush.msrb.mxu2 %v2122_v38 }
  0x37   :  { %432 = vmatpush.msrb.mxu0 %v2100_v31  ;;  %502 = vmatpush.msrb.mxu1 %v2005_v3 }
  0x38   :  { %396 = vmatpush.msra.mxu3 %v2091_v28  ;;  %522 = vmatpush.msrb.mxu2 %v2134_v42 }
  0x39   :  { %433 = vmatpush.msrb.mxu0 %v2117_v36  ;;  %503 = vmatpush.msrb.mxu1 %v2010_v5 }
  0x3a   :  { %397 = vmatpush.msra.mxu3 %v2096_v30  ;;  %1538 = vmatmul.msk.f32.gmra.mxu1 %vm157_vm0, %v2051_v17 }
  0x3b   :  { %434 = vmatpush.msrb.mxu0 %v2129_v40  ;;  %523 = vmatpush.msrb.mxu2 %v2148_v47 }
  0x3c   :  { %398 = vmatpush.msra.mxu3 %v2105_v33  ;;  %1532 = vmatmul.msk.f32.gmra.mxu0 %vm157_vm0, %v2110_v34 }
  0x3d   :  { %399 = vmatmul.f32.vlgmr.msra.gmra.mxu3 %v1916_v41  ;;  %435 = vmatpush.msrb.mxu0 %v2143_v45 }
  0x3e   :  { %403 = vmatpush.msrb.mxu3 %v2122_v38  ;;  %504 = vmatpush.msrb.mxu1 %v2016_v7 }
  0x3f   :  { %436 = vmatpush.msrb.mxu0 %v2155_v49  ;;  %1546 = vmatmul.msk.f32.gmra.mxu2 %vm157_vm0, %v2051_v17 }
  0x40   :  { %404 = vmatpush.msrb.mxu3 %v2134_v42  ;;  %524 = vmatpush.msrb.mxu2 %v2157_v50 }
  0x41   :  { %437 = vmatpush.msrb.mxu0 %v2171_v53  ;;  %505 = vmatpush.msrb.mxu1 %v2024_v9 }
  0x42   :  { %405 = vmatpush.msrb.mxu3 %v2148_v47  ;;  %525 = vmatpush.msrb.mxu2 %v2168_v52 }
  0x43   :  { %438 = vmatpush.msrb.mxu0 %v2180_v55  ;;  %506 = vmatpush.msrb.mxu1 %v2031_v11 }
  0x44   :  { %406 = vmatpush.msrb.mxu3 %v2157_v50  ;;  %1533 = vmatmul.msk.f32.gmra.mxu0 %vm157_vm0, %v2164_v51 }
  0x45   :  { %615 = vmatpush.msra.mxu0 %v1999_v1  ;;  %526 = vmatpush.msrb.mxu2 %v2178_v54 }
  0x46   :  { %407 = vmatpush.msrb.mxu3 %v2168_v52  ;;  %1539 = vmatmul.msk.f32.gmra.mxu1 %vm157_vm0, %v2080_v25 }
  0x47   :  { %616 = vmatpush.msra.mxu0 %v2005_v3  ;;  %507 = vmatpush.msrb.mxu1 %v2037_v13 }
  0x48   :  { %408 = vmatpush.msrb.mxu3 %v2178_v54  ;;  %527 = vmatpush.msrb.mxu2 %v2185_v56 }
  0x49   :  { %1547 = vmatmul.msk.f32.gmra.mxu2 %vm157_vm0, %v2080_v25  ;;  %508 = vmatpush.msrb.mxu1 %v2042_v15  ;;  %v149_v25 = vld [vmem:[#allocation3] sm:$0x7] }
  0x4a   :  { %409 = vmatpush.msrb.mxu3 %v2185_v56  ;;  %528 = vmatpush.msrb.mxu2 %v2191_v57  ;;  %v151_v32 = vperm.slane %v149_v25, 0 }
  0x4b   :  { %509 = vmatpush.msrb.mxu1 %v2054_v18  ;;  %617 = vmatpush.msra.mxu0 %v2010_v5 }
  0x4c   :  { %410 = vmatpush.msrb.mxu3 %v2191_v57  ;;  %1534 = vmatmul.msk.f32.gmra.mxu0 %vm157_vm0, %v2199_v58 }
  0x4d   :  { %529 = vmatpush.msrb.mxu2 %v2203_v59  ;;  %510 = vmatpush.msrb.mxu1 %v2062_v20 }
  0x4e   :  { %411 = vmatpush.msrb.mxu3 %v2203_v59  ;;  %618 = vmatpush.msra.mxu0 %v2016_v7 }
  0x4f   :  { %1540 = vmatmul.msk.f32.gmra.mxu1 %vm157_vm0, %v2110_v34  ;;  %530 = vmatpush.msrb.mxu2 %v2212_v60 }
  0x50   :  { %412 = vmatpush.msrb.mxu3 %v2212_v60  ;;  %511 = vmatpush.msrb.mxu1 %v2068_v22 }
  0x51   :  { %1548 = vmatmul.msk.f32.gmra.mxu2 %vm157_vm0, %v2110_v34  ;;  %619 = vmatpush.msra.mxu0 %v2024_v9 }
  0x52   :  { %413 = vmatpush.msrb.mxu3 %v2217_v61  ;;  %531 = vmatpush.msrb.mxu2 %v2217_v61 }
  0x53   :  { %512 = vmatpush.msrb.mxu1 %v2074_v24  ;;  %620 = vmatpush.msra.mxu0 %v2031_v11 }
  0x54   :  { %414 = vmatpush.msrb.mxu3 %v2223_v62  ;;  %1535 = vmatmul.msk.f32.gmra.mxu0 %vm157_vm0, %v2231_v63 }
  0x55   :  { %532 = vmatpush.msrb.mxu2 %v2223_v62  ;;  %513 = vmatpush.msrb.mxu1 %v2085_v27 }
  0x56   :  { %415 = vmatpush.msrb.mxu3 %v2235_v0  ;;  %621 = vmatpush.msra.mxu0 %v2037_v13 }
  0x57   :  { %1541 = vmatmul.msk.f32.gmra.mxu1 %vm157_vm0, %v2164_v51  ;;  %533 = vmatpush.msrb.mxu2 %v2235_v0 }
  0x58   :  { %416 = vmatpush.msrb.mxu3 %v2244_v2  ;;  %514 = vmatpush.msrb.mxu1 %v2091_v28 }
  0x59   :  { %1549 = vmatmul.msk.f32.gmra.mxu2 %vm157_vm0, %v2164_v51  ;;  %622 = vmatpush.msra.mxu0 %v2042_v15 }
  0x5a   :  { %417 = vmatpush.msrb.mxu3 %v2249_v4  ;;  %534 = vmatpush.msrb.mxu2 %v2244_v2 }
  0x5b   :  { %515 = vmatpush.msrb.mxu1 %v2096_v30  ;;  %623 = vmatpush.msra.mxu0 %v2054_v18 }
  0x5c   :  { %418 = vmatpush.msrb.mxu3 %v2255_v6  ;;  %1536 = vmatmul.msk.f32.gmra.mxu0 %vm157_vm0, %v2263_v8 }
  0x5d   :  { %419 = vmatmul.f32.vlgmr.msrb.gmra.mxu3 %v1916_v41  ;;  %535 = vmatpush.msrb.mxu2 %v2249_v4 }
  0x5e   :  { %541 = vmatpush.msra.mxu3 %v2026_v10  ;;  %516 = vmatpush.msrb.mxu1 %v2105_v33 }
  0x5f   :  { %536 = vmatpush.msrb.mxu2 %v2255_v6  ;;  %1542 = vmatmul.msk.f32.gmra.mxu1 %vm157_vm0, %v2199_v58 }
  0x60   :  { %542 = vmatpush.msra.mxu3 %v2033_v12  ;;  %635 = vmatpush.msra.mxu1 %v2122_v38 }
  0x61   :  { %655 = vmatpush.msra.mxu2 %v2026_v10  ;;  %624 = vmatpush.msra.mxu0 %v2062_v20 }
  0x62   :  { %543 = vmatpush.msra.mxu3 %v2039_v14  ;;  %636 = vmatpush.msra.mxu1 %v2134_v42 }
  0x63   :  { %1550 = vmatmul.msk.f32.gmra.mxu2 %vm157_vm0, %v2199_v58  ;;  %625 = vmatpush.msra.mxu0 %v2068_v22 }
  0x64   :  { %544 = vmatpush.msra.mxu3 %v2045_v16  ;;  %439 = vmatmul.f32.vlgmr.msrb.gmra.mxu0 %v1916_v41 }
  0x65   :  { %656 = vmatpush.msra.mxu2 %v2033_v12  ;;  %637 = vmatpush.msra.mxu1 %v2148_v47 }
  0x66   :  { %545 = vmatpush.msra.mxu3 %v2056_v19  ;;  %626 = vmatpush.msra.mxu0 %v2074_v24 }
  0x67   :  { %657 = vmatpush.msra.mxu2 %v2039_v14  ;;  %638 = vmatpush.msra.mxu1 %v2157_v50 }
  0x68   :  { %546 = vmatpush.msra.mxu3 %v2064_v21  ;;  %1543 = vmatmul.msk.f32.gmra.mxu1 %vm157_vm0, %v2231_v63 }
  0x69   :  { %658 = vmatpush.msra.mxu2 %v2045_v16  ;;  %639 = vmatpush.msra.mxu1 %v2168_v52 }
  0x6a   :  { %547 = vmatpush.msra.mxu3 %v2070_v23  ;;  %627 = vmatpush.msra.mxu0 %v2085_v27 }
  0x6b   :  { %659 = vmatpush.msra.mxu2 %v2056_v19  ;;  %640 = vmatpush.msra.mxu1 %v2178_v54 }
  0x6c   :  { %548 = vmatpush.msra.mxu3 %v2083_v26  ;;  %1551 = vmatmul.msk.f32.gmra.mxu2 %vm157_vm0, %v2231_v63 }
  0x6d   :  { %660 = vmatpush.msra.mxu2 %v2064_v21  ;;  %641 = vmatpush.msra.mxu1 %v2185_v56 }
  0x6e   :  { %549 = vmatpush.msra.mxu3 %v2094_v29  ;;  %628 = vmatpush.msra.mxu0 %v2091_v28 }
  0x6f   :  { %661 = vmatpush.msra.mxu2 %v2070_v23  ;;  %642 = vmatpush.msra.mxu1 %v2191_v57 }
  0x70   :  { %550 = vmatpush.msra.mxu3 %v2100_v31  ;;  %1544 = vmatmul.msk.f32.gmra.mxu1 %vm157_vm0, %v2263_v8 }
  0x71   :  { %662 = vmatpush.msra.mxu2 %v2083_v26  ;;  %643 = vmatpush.msra.mxu1 %v2203_v59 }
  0x72   :  { %551 = vmatpush.msra.mxu3 %v2117_v36  ;;  %629 = vmatpush.msra.mxu0 %v2096_v30 }
  0x73   :  { %663 = vmatpush.msra.mxu2 %v2094_v29  ;;  %644 = vmatpush.msra.mxu1 %v2212_v60 }
  0x74   :  { %552 = vmatpush.msra.mxu3 %v2129_v40  ;;  %1552 = vmatmul.msk.f32.gmra.mxu2 %vm157_vm0, %v2263_v8 }
  0x75   :  { %664 = vmatpush.msra.mxu2 %v2100_v31  ;;  %645 = vmatpush.msra.mxu1 %v2217_v61 }
  0x76   :  { %553 = vmatpush.msra.mxu3 %v2143_v45  ;;  %630 = vmatpush.msra.mxu0 %v2105_v33 }
  0x77   :  { %665 = vmatpush.msra.mxu2 %v2117_v36  ;;  %646 = vmatpush.msra.mxu1 %v2223_v62 }
  0x78   :  { %554 = vmatpush.msra.mxu3 %v2155_v49  ;;  %749 = vmatpush.msrb.mxu0 %v2122_v38 }
  0x79   :  { %666 = vmatpush.msra.mxu2 %v2129_v40  ;;  %647 = vmatpush.msra.mxu1 %v2235_v0 }
  0x7a   :  { %555 = vmatpush.msra.mxu3 %v2171_v53  ;;  %750 = vmatpush.msrb.mxu0 %v2134_v42 }
  0x7b   :  { %667 = vmatpush.msra.mxu2 %v2143_v45  ;;  %648 = vmatpush.msra.mxu1 %v2244_v2 }
  0x7c   :  { %556 = vmatpush.msra.mxu3 %v2180_v55  ;;  %751 = vmatpush.msrb.mxu0 %v2148_v47 }
  0x7d   :  { %668 = vmatpush.msra.mxu2 %v2155_v49  ;;  %649 = vmatpush.msra.mxu1 %v2249_v4 }
  0x7e   :  { %729 = vmatpush.msrb.mxu3 %v1999_v1  ;;  %752 = vmatpush.msrb.mxu0 %v2157_v50 }
  0x7f   :  { %669 = vmatpush.msra.mxu2 %v2171_v53  ;;  %650 = vmatpush.msra.mxu1 %v2255_v6 }
  0x80   :  { %730 = vmatpush.msrb.mxu3 %v2005_v3  ;;  %753 = vmatpush.msrb.mxu0 %v2168_v52 }
  0x81   :  { %670 = vmatpush.msra.mxu2 %v2180_v55 }
  0x82   :  { %731 = vmatpush.msrb.mxu3 %v2010_v5  ;;  %754 = vmatpush.msrb.mxu0 %v2178_v54 }
  0x84   :  { %732 = vmatpush.msrb.mxu3 %v2016_v7  ;;  %755 = vmatpush.msrb.mxu0 %v2185_v56 }
  0x86   :  { %733 = vmatpush.msrb.mxu3 %v2024_v9  ;;  %756 = vmatpush.msrb.mxu0 %v2191_v57 }
  0x88   :  { %734 = vmatpush.msrb.mxu3 %v2031_v11  ;;  %757 = vmatpush.msrb.mxu0 %v2203_v59 }
  0x8a   :  { %735 = vmatpush.msrb.mxu3 %v2037_v13  ;;  %758 = vmatpush.msrb.mxu0 %v2212_v60 }
  0x8c   :  { %736 = vmatpush.msrb.mxu3 %v2042_v15  ;;  %759 = vmatpush.msrb.mxu0 %v2217_v61 }
  0x8e   :  { %737 = vmatpush.msrb.mxu3 %v2054_v18  ;;  %760 = vmatpush.msrb.mxu0 %v2223_v62 }
  0x90   :  { %738 = vmatpush.msrb.mxu3 %v2062_v20  ;;  %761 = vmatpush.msrb.mxu0 %v2235_v0 }
  0x92   :  { %739 = vmatpush.msrb.mxu3 %v2068_v22  ;;  %762 = vmatpush.msrb.mxu0 %v2244_v2 }
  0x94   :  { %740 = vmatpush.msrb.mxu3 %v2074_v24  ;;  %763 = vmatpush.msrb.mxu0 %v2249_v4 }
  0x96   :  { %741 = vmatpush.msrb.mxu3 %v2085_v27  ;;  %764 = vmatpush.msrb.mxu0 %v2255_v6 }
  0x98   :  { %742 = vmatpush.msrb.mxu3 %v2091_v28 }
  0x9a   :  { %743 = vmatpush.msrb.mxu3 %v2096_v30 }
  0x9c   :  { %744 = vmatpush.msrb.mxu3 %v2105_v33 }
  0xa1   :  { %v199_v17 = vpop.f32.mrf.mxu0 }
  0xa2   :  { %v200_v44 = vadd.f32 %v199_v17, %v151_v32 }
  0xa9   :  { %v202_v34 = vpop.f32.mrf.mxu0 }
  0xaa   :  { %v2395_v35 = vadd.f32 %v202_v34, %v151_v32 }
  0xac   :  { %2892 = vst [vmem:[#allocation30_spill] sm:$0xff] %v2395_v35 }
  0xae   :  { %v240_v17 = vpop.f32.mrf.mxu1 }
  0xb1   :  { %v205_v37 = vpop.f32.mrf.mxu0 }
  0xb2   :  { %v2397_v39 = vadd.f32 %v205_v37, %v151_v32  ;;  %v2407_v37 = vperm.slane %v149_v25, 1 }
  0xb4   :  { %2893 = vst [vmem:[#allocation31_spill] sm:$0xff] %v2397_v39 }
  0xb5   :  { %2898 = vst [vmem:[#allocation36_spill] sm:$0xff] %v2407_v37 }
  0xb9   :  { %v208_v41 = vpop.f32.mrf.mxu0 }
  0xba   :  { %v2399_v43 = vadd.f32 %v208_v41, %v151_v32 }
  0xbc   :  { %2894 = vst [vmem:[#allocation32_spill] sm:$0xff] %v2399_v43 }
  0xc0   :  { %v400_v46 = vpop.f32.mrf.mxu3 }
  0xc1   :  { %v443_v48 = vadd.f32 %v400_v46, %v200_v44  ;;  %v211_v51 = vpop.f32.mrf.mxu0  ;;  %v241_v46 = vadd.f32 %v240_v17, %v2407_v37 }
  0xc2   :  { %v2401_v58 = vadd.f32 %v211_v51, %v151_v32 }
  0xc3   :  { %v1553_v63 = vmul.f32 -1.442695, %v443_v48 }
  0xc4   :  { %2895 = vst [vmem:[#allocation33_spill] sm:$0xff] %v2401_v58 }
  0xc5   :  { %1589 = vpow2.f32 %v1553_v63 }
  0xc9   :  { %v214_v8 = vpop.f32.mrf.mxu0 }
  0xca   :  { %v2403_v6 = vadd.f32 %v214_v8, %v151_v32 }
  0xcb   :  { %v1590_v33 = vpop.eup %1589 }
  0xcc   :  { %2896 = vst [vmem:[#allocation34_spill] sm:$0xff] %v2403_v6  ;;  %v451_v34 = vadd.f32 1.0, %v1590_v33 }
  0xce   :  { %1591 = vrcp.f32 %v451_v34  ;;  %v464_v4 = vand.u32 2147483648, %v451_v34  ;;  %vm458_vm2 = vweird.f32 %v451_v34 }
  0xd1   :  { %v217_v35 = vpop.f32.mrf.mxu0 }
  0xd2   :  { %v2405_v55 = vadd.f32 %v217_v35, %v151_v32  ;;  %v2412_v35 = vld [vmem:[#allocation8] ss:$0 sm:$0xff] }
  0xd4   :  { %2897 = vst [vmem:[#allocation35_spill] sm:$0xff] %v2405_v55  ;;  %v1592_v43 = vpop.eup %1591 }
  0xd5   :  { %v454_v48 = vmul.f32 %v1592_v43, %v451_v34  ;;  %vm459_vm1 = vweird.f32 %v1592_v43 }
  0xd6   :  { %vm460_vm3 = vmor %vm458_vm2, %vm459_vm1 }
  0xd7   :  { %v455_v8 = vsub.f32 1.0, %v454_v48  ;;  %v465_v48 = vor.u32 1.1754944e-38, %v464_v4 }
  0xd9   :  { %v220_v41 = vpop.f32.mrf.mxu0  ;;  %v456_v33 = vmul.f32 %v1592_v43, %v455_v8 }
  0xda   :  { %v2409_v44 = vadd.f32 %v220_v41, %v151_v32  ;;  %v462_v32 = vand.u32 2147483647, %v451_v34 }
  0xdb   :  { %v457_v58 = vadd.f32 %v1592_v43, %v456_v33 }
  0xdc   :  { %2899 = vst [vmem:[#allocation37_spill] sm:$0xff] %v2409_v44  ;;  %vm463_vm4 = vcmp.eq.f32.partialorder %v462_v32, 8.507059e+37 }
  0xdd   :  { %v461_v41 = vsel %vm460_vm3, %v1592_v43, %v457_v58 }
  0xe0   :  { %v420_v51 = vpop.f32.mrf.mxu3 }
  0xe1   :  { %v444_v63 = vadd.f32 %v420_v51, %v241_v46  ;;  %v440_v39 = vpop.f32.mrf.mxu0  ;;  %v2415_v46 = vperm.slane %v149_v25, 2  ;;  %v466_v51 = vsel %vm463_vm4, %v465_v48, %v461_v41 }
  0xe2   :  { %v487_v17 = vadd.f32 %v2412_v35, %v440_v39 }
  0xe3   :  { %v1554_v6 = vmul.f32 -1.442695, %v444_v63 }
  0xe4   :  { %v488_v63 = vmul.f32 %v487_v17, %v466_v51  ;;  %v2906_v51 = vld [vmem:[#allocation29_spill] sm:$0xff] }
  0xe5   :  { %1593 = vpow2.f32 %v1554_v6  ;;  %v281_v6 = vpop.f32.mrf.mxu2 }
  0xe6   :  { %v282_v8 = vadd.f32 %v281_v6, %v2415_v46  ;;  %v2905_v6 = vld [vmem:[#allocation22_spill] sm:$0xff] }
  0xe8   :  { %v489_v37 = vadd.f32 %v488_v63, %v282_v8  ;;  %v243_v63 = vpop.f32.mrf.mxu1 }
  0xeb   :  { %v1594_v55 = vpop.eup %1593 }
  0xec   :  { %v452_v30 = vadd.f32 1.0, %v1594_v55 }
  0xed   :  { %v284_v8 = vpop.f32.mrf.mxu2 }
  0xee   :  { %1595 = vrcp.f32 %v452_v30  ;;  %v479_v53 = vand.u32 2147483648, %v452_v30  ;;  %v477_v2 = vand.u32 2147483647, %v452_v30  ;;  %vm473_vm6 = vweird.f32 %v452_v30 }
  0xef   :  { %1597 = vtanh.f32 %v489_v37  ;;  %v2903_v37 = vld [vmem:[#allocation28_spill] sm:$0xff] }
  0xf0   :  { %v480_v25 = vor.u32 1.1754944e-38, %v479_v53  ;;  %vm478_vm8 = vcmp.eq.f32.partialorder %v477_v2, 8.507059e+37  ;;  %v2901_v53 = vld [vmem:[#allocation24_spill] sm:$0xff]  ;;  %v2902_v2 = vld [vmem:[#allocation21_spill] sm:$0xff] }
  0xf4   :  { %v1596_v33 = vpop.eup %1595 }
  0xf5   :  { %v469_v44 = vmul.f32 %v1596_v33, %v452_v30  ;;  %vm474_vm5 = vweird.f32 %v1596_v33  ;;  %v1598_v32 = vpop.eup %1597  ;;  %v2900_v30 = vld [vmem:[#allocation27_spill] sm:$0xff] }
  0xf6   :  { %vm475_vm7 = vmor %vm473_vm6, %vm474_vm5 }
  0xf7   :  { %v470_v55 = vsub.f32 1.0, %v469_v44  ;;  %v2904_v44 = vld [vmem:[#allocation25_spill] sm:$0xff] }
  0xf9   :  { %v471_v34 = vmul.f32 %v1596_v33, %v470_v55  ;;  %v2473_v55 = vpop.f32.mrf.mxu2 }
  0xfa   :  { %2908 = vst [vmem:[#allocation39_spill] sm:$0xff] %v2473_v55 }
  0xfb   :  { %v472_v39 = vadd.f32 %v1596_v33, %v471_v34 }
  0xfd   :  { %v476_v4 = vsel %vm475_vm7, %v1596_v33, %v472_v39  ;;  %v2471_v33 = vpop.f32.mrf.mxu1 }
  0xfe   :  { %v481_v43 = vsel %vm478_vm8, %v480_v25, %v476_v4  ;;  %2907 = vst [vmem:[#allocation38_spill] sm:$0xff] %v2471_v33 }
  0xff   :  { %v491_v58 = vsub.f32 1.0, %v481_v43  ;;  %v493_v17 = vmul.f32 0.0, %v481_v43 }
 0x101   :  { %v492_v41 = vmul.f32 %v1598_v32, %v491_v58  ;;  %v2477_v39 = vpop.f32.mrf.mxu2 }
 0x102   :  { %2910 = vst [vmem:[#allocation41_spill] sm:$0xff] %v2477_v39 }
 0x103   :  { %v2418_v48 = vadd.f32 %v493_v17, %v492_v41 }
 0x105   :  { %517 = vmatmul.f32.vlgmr.msrb.gmra.mxu1 %v2418_v48  ;;  %537 = vmatmul.f32.vlgmr.msrb.gmra.mxu2 %v2418_v48  ;;  %v2475_v34 = vpop.f32.mrf.mxu1 }
 0x106   :  { %557 = vmatmul.f32.vlgmr.msra.gmra.mxu3 %v2418_v48  ;;  %769 = vmatpush.msrb.mxu1 %v2026_v10  ;;  %2909 = vst [vmem:[#allocation40_spill] sm:$0xff] %v2475_v34  ;;  %v2919_v34 = vld [vmem:[#allocation30_spill] sm:$0xff] }
 0x107   :  { %843 = vmatpush.msrb.mxu2 %v1999_v1  ;;  %863 = vmatpush.msra.mxu3 %v2122_v38 }
 0x108   :  { %770 = vmatpush.msrb.mxu1 %v2033_v12 }
 0x109   :  { %844 = vmatpush.msrb.mxu2 %v2005_v3  ;;  %864 = vmatpush.msra.mxu3 %v2134_v42  ;;  %v2481_v4 = vpop.f32.mrf.mxu2 }
 0x10a   :  { %771 = vmatpush.msrb.mxu1 %v2039_v14  ;;  %2912 = vst [vmem:[#allocation43_spill] sm:$0xff] %v2481_v4 }
 0x10b   :  { %845 = vmatpush.msrb.mxu2 %v2010_v5  ;;  %865 = vmatpush.msra.mxu3 %v2148_v47 }
 0x10c   :  { %772 = vmatpush.msrb.mxu1 %v2045_v16 }
 0x10d   :  { %846 = vmatpush.msrb.mxu2 %v2016_v7  ;;  %866 = vmatpush.msra.mxu3 %v2157_v50  ;;  %v2479_v25 = vpop.f32.mrf.mxu1 }
 0x10e   :  { %773 = vmatpush.msrb.mxu1 %v2056_v19  ;;  %2911 = vst [vmem:[#allocation42_spill] sm:$0xff] %v2479_v25 }
 0x10f   :  { %847 = vmatpush.msrb.mxu2 %v2024_v9  ;;  %867 = vmatpush.msra.mxu3 %v2168_v52 }
 0x110   :  { %774 = vmatpush.msrb.mxu1 %v2064_v21 }
 0x111   :  { %848 = vmatpush.msrb.mxu2 %v2031_v11  ;;  %868 = vmatpush.msra.mxu3 %v2178_v54  ;;  %v2485_v58 = vpop.f32.mrf.mxu2 }
 0x112   :  { %775 = vmatpush.msrb.mxu1 %v2070_v23  ;;  %2914 = vst [vmem:[#allocation45_spill] sm:$0xff] %v2485_v58 }
 0x113   :  { %849 = vmatpush.msrb.mxu2 %v2037_v13  ;;  %869 = vmatpush.msra.mxu3 %v2185_v56 }
 0x114   :  { %776 = vmatpush.msrb.mxu1 %v2083_v26 }
 0x115   :  { %850 = vmatpush.msrb.mxu2 %v2042_v15  ;;  %870 = vmatpush.msra.mxu3 %v2191_v57  ;;  %v2483_v43 = vpop.f32.mrf.mxu1 }
 0x116   :  { %777 = vmatpush.msrb.mxu1 %v2094_v29  ;;  %2913 = vst [vmem:[#allocation44_spill] sm:$0xff] %v2483_v43 }
 0x117   :  { %851 = vmatpush.msrb.mxu2 %v2054_v18  ;;  %871 = vmatpush.msra.mxu3 %v2203_v59 }
 0x118   :  { %778 = vmatpush.msrb.mxu1 %v2100_v31 }
 0x119   :  { %852 = vmatpush.msrb.mxu2 %v2062_v20  ;;  %872 = vmatpush.msra.mxu3 %v2212_v60  ;;  %v2489_v41 = vpop.f32.mrf.mxu2 }
 0x11a   :  { %779 = vmatpush.msrb.mxu1 %v2117_v36  ;;  %2916 = vst [vmem:[#allocation47_spill] sm:$0xff] %v2489_v41 }
 0x11b   :  { %853 = vmatpush.msrb.mxu2 %v2068_v22  ;;  %873 = vmatpush.msra.mxu3 %v2217_v61 }
 0x11c   :  { %780 = vmatpush.msrb.mxu1 %v2129_v40 }
 0x11d   :  { %854 = vmatpush.msrb.mxu2 %v2074_v24  ;;  %874 = vmatpush.msra.mxu3 %v2223_v62  ;;  %v2487_v32 = vpop.f32.mrf.mxu1 }
 0x11e   :  { %781 = vmatpush.msrb.mxu1 %v2143_v45  ;;  %2915 = vst [vmem:[#allocation46_spill] sm:$0xff] %v2487_v32 }
 0x11f   :  { %855 = vmatpush.msrb.mxu2 %v2085_v27  ;;  %875 = vmatpush.msra.mxu3 %v2235_v0 }
 0x120   :  { %782 = vmatpush.msrb.mxu1 %v2155_v49 }
 0x121   :  { %856 = vmatpush.msrb.mxu2 %v2091_v28  ;;  %876 = vmatpush.msra.mxu3 %v2900_v30  ;;  %v2493_v33 = vpop.f32.mrf.mxu2 }
 0x122   :  { %783 = vmatpush.msrb.mxu1 %v2901_v53  ;;  %2918 = vst [vmem:[#allocation49_spill] sm:$0xff] %v2493_v33 }
 0x123   :  { %857 = vmatpush.msrb.mxu2 %v2902_v2  ;;  %877 = vmatpush.msra.mxu3 %v2903_v37 }
 0x124   :  { %784 = vmatpush.msrb.mxu1 %v2904_v44 }
 0x125   :  { %858 = vmatpush.msrb.mxu2 %v2905_v6  ;;  %878 = vmatpush.msra.mxu3 %v2906_v51  ;;  %v2491_v17 = vpop.f32.mrf.mxu1  ;;  %v2920_v6 = vld [vmem:[#allocation36_spill] sm:$0xff] }
 0x126   :  { %2917 = vst [vmem:[#allocation48_spill] sm:$0xff] %v2491_v17  ;;  %v244_v25 = vadd.f32 %v243_v63, %v2920_v6 }
 0x182   :  { %v518_v55 = vpop.f32.mrf.mxu1 }
 0x183   :  { %v561_v51 = vadd.f32 %v518_v55, %v2919_v34 }
 0x185   :  { %v1555_v39 = vmul.f32 -1.442695, %v561_v51 }
 0x187   :  { %1599 = vpow2.f32 %v1555_v39 }
 0x188   :  { %v538_v4 = vpop.f32.mrf.mxu2 }
 0x189   :  { %v562_v44 = vadd.f32 %v538_v4, %v244_v25  ;;  %v558_v63 = vpop.f32.mrf.mxu3 }
 0x18a   :  { %v601_v4 = vadd.f32 %v2412_v35, %v558_v63 }
 0x18b   :  { %v1556_v43 = vmul.f32 -1.442695, %v562_v44 }
 0x18d   :  { %v1600_v37 = vpop.eup %1599  ;;  %1601 = vpow2.f32 %v1556_v43  ;;  %v285_v43 = vadd.f32 %v284_v8, %v2415_v46 }
 0x18e   :  { %v569_v58 = vadd.f32 1.0, %v1600_v37 }
 0x190   :  { %1603 = vrcp.f32 %v569_v58  ;;  %v582_v53 = vand.u32 2147483648, %v569_v58  ;;  %v580_v51 = vand.u32 2147483647, %v569_v58  ;;  %vm576_vm10 = vweird.f32 %v569_v58 }
 0x192   :  { %v583_v44 = vor.u32 1.1754944e-38, %v582_v53  ;;  %vm581_vm12 = vcmp.eq.f32.partialorder %v580_v51, 8.507059e+37 }
 0x193   :  { %v1602_v32 = vpop.eup %1601 }
 0x194   :  { %v570_v41 = vadd.f32 1.0, %v1602_v32 }
 0x196   :  { %v1604_v2 = vpop.eup %1603  ;;  %1605 = vrcp.f32 %v570_v41  ;;  %v595_v28 = vand.u32 2147483647, %v570_v41  ;;  %vm591_vm14 = vweird.f32 %v570_v41 }
 0x197   :  { %v572_v17 = vmul.f32 %v1604_v2, %v569_v58  ;;  %vm577_vm9 = vweird.f32 %v1604_v2 }
 0x198   :  { %vm578_vm11 = vmor %vm576_vm10, %vm577_vm9  ;;  %vm596_vm1 = vcmp.eq.f32.partialorder %v595_v28, 8.507059e+37 }
 0x199   :  { %v573_v33 = vsub.f32 1.0, %v572_v17 }
 0x19b   :  { %v574_v30 = vmul.f32 %v1604_v2, %v573_v33  ;;  %v597_v33 = vand.u32 2147483648, %v570_v41 }
 0x19c   :  { %v1606_v55 = vpop.eup %1605 }
 0x19d   :  { %v587_v34 = vmul.f32 %v1606_v55, %v570_v41  ;;  %v575_v39 = vadd.f32 %v1604_v2, %v574_v30  ;;  %vm592_vm13 = vweird.f32 %v1606_v55  ;;  %v598_v53 = vor.u32 1.1754944e-38, %v597_v33 }
 0x19e   :  { %vm593_vm15 = vmor %vm591_vm14, %vm592_vm13 }
 0x19f   :  { %v588_v25 = vsub.f32 1.0, %v587_v34  ;;  %v579_v37 = vsel %vm578_vm11, %v1604_v2, %v575_v39 }
 0x1a0   :  { %v584_v32 = vsel %vm581_vm12, %v583_v44, %v579_v37 }
 0x1a1   :  { %v589_v17 = vmul.f32 %v1606_v55, %v588_v25  ;;  %v602_v6 = vmul.f32 %v601_v4, %v584_v32  ;;  %v2934_v32 = vld [vmem:[#allocation39_spill] sm:$0xff] }
 0x1a3   :  { %v603_v49 = vadd.f32 %v602_v6, %v285_v43  ;;  %v590_v0 = vadd.f32 %v1606_v55, %v589_v17  ;;  %v288_v17 = vadd.f32 %v2934_v32, %v2415_v46 }
 0x1a5   :  { %1607 = vtanh.f32 %v603_v49  ;;  %v594_v30 = vsel %vm593_vm15, %v1606_v55, %v590_v0 }
 0x1a6   :  { %v599_v2 = vsel %vm596_vm1, %v598_v53, %v594_v30 }
 0x1a7   :  { %v605_v58 = vsub.f32 1.0, %v599_v2  ;;  %v607_v8 = vmul.f32 %v599_v2, %v2418_v48 }
 0x1ab   :  { %v1608_v51 = vpop.eup %1607 }
 0x1ac   :  { %v606_v63 = vmul.f32 %v1608_v51, %v605_v58 }
 0x1ae   :  { %v2500_v34 = vadd.f32 %v607_v8, %v606_v63 }
 0x1b0   :  { %631 = vmatmul.f32.vlgmr.msra.gmra.mxu0 %v2500_v34  ;;  %651 = vmatmul.f32.vlgmr.msra.gmra.mxu1 %v2500_v34 }
 0x1b1   :  { %671 = vmatmul.f32.vlgmr.msra.gmra.mxu2 %v2500_v34  ;;  %883 = vmatpush.msra.mxu0 %v2026_v10  ;;  %v2926_v10 = vld [vmem:[#allocation21_spill] sm:$0xff] }
 0x1b2   :  { %957 = vmatpush.msra.mxu1 %v1999_v1  ;;  %977 = vmatpush.msra.mxu2 %v2122_v38  ;;  %v2921_v1 = vld [vmem:[#allocation26_spill] sm:$0xff] }
 0x1b3   :  { %884 = vmatpush.msra.mxu0 %v2033_v12  ;;  %v2928_v12 = vld [vmem:[#allocation25_spill] sm:$0xff] }
 0x1b4   :  { %958 = vmatpush.msra.mxu1 %v2005_v3  ;;  %978 = vmatpush.msra.mxu2 %v2134_v42  ;;  %v2922_v3 = vld [vmem:[#allocation23_spill] sm:$0xff] }
 0x1b5   :  { %885 = vmatpush.msra.mxu0 %v2039_v14  ;;  %v2930_v14 = vld [vmem:[#allocation29_spill] sm:$0xff] }
 0x1b6   :  { %959 = vmatpush.msra.mxu1 %v2010_v5  ;;  %979 = vmatpush.msra.mxu2 %v2148_v47  ;;  %v2923_v5 = vld [vmem:[#allocation20_spill] sm:$0xff] }
 0x1b7   :  { %886 = vmatpush.msra.mxu0 %v2045_v16  ;;  %v2932_v16 = vld [vmem:[#allocation38_spill] sm:$0xff] }
 0x1b8   :  { %960 = vmatpush.msra.mxu1 %v2016_v7  ;;  %980 = vmatpush.msra.mxu2 %v2157_v50  ;;  %v2924_v7 = vld [vmem:[#allocation27_spill] sm:$0xff] }
 0x1b9   :  { %887 = vmatpush.msra.mxu0 %v2056_v19 }
 0x1ba   :  { %961 = vmatpush.msra.mxu1 %v2024_v9  ;;  %981 = vmatpush.msra.mxu2 %v2168_v52  ;;  %v2925_v9 = vld [vmem:[#allocation24_spill] sm:$0xff] }
 0x1bb   :  { %888 = vmatpush.msra.mxu0 %v2064_v21  ;;  %v2933_v21 = vld [vmem:[#allocation31_spill] sm:$0xff] }
 0x1bc   :  { %962 = vmatpush.msra.mxu1 %v2031_v11  ;;  %982 = vmatpush.msra.mxu2 %v2178_v54  ;;  %v2927_v11 = vld [vmem:[#allocation28_spill] sm:$0xff] }
 0x1bd   :  { %889 = vmatpush.msra.mxu0 %v2070_v23 }
 0x1be   :  { %963 = vmatpush.msra.mxu1 %v2037_v13  ;;  %983 = vmatpush.msra.mxu2 %v2185_v56  ;;  %v2929_v13 = vld [vmem:[#allocation22_spill] sm:$0xff] }
 0x1bf   :  { %890 = vmatpush.msra.mxu0 %v2083_v26 }
 0x1c0   :  { %964 = vmatpush.msra.mxu1 %v2042_v15  ;;  %984 = vmatpush.msra.mxu2 %v2191_v57  ;;  %v2931_v15 = vld [vmem:[#allocation36_spill] sm:$0xff] }
 0x1c1   :  { %891 = vmatpush.msra.mxu0 %v2094_v29 }
 0x1c2   :  { %965 = vmatpush.msra.mxu1 %v2054_v18  ;;  %985 = vmatpush.msra.mxu2 %v2203_v59  ;;  %v247_v18 = vadd.f32 %v2932_v16, %v2931_v15  ;;  %v2571_v16 = vld [vmem:[#allocation6 + $0x170] sm:$0xff] }
 0x1c3   :  { %892 = vmatpush.msra.mxu0 %v2100_v31 }
 0x1c4   :  { %966 = vmatpush.msra.mxu1 %v2062_v20  ;;  %986 = vmatpush.msra.mxu2 %v2212_v60 }
 0x1c5   :  { %893 = vmatpush.msra.mxu0 %v2117_v36 }
 0x1c6   :  { %967 = vmatpush.msra.mxu1 %v2068_v22  ;;  %987 = vmatpush.msra.mxu2 %v2217_v61 }
 0x1c7   :  { %894 = vmatpush.msra.mxu0 %v2129_v40 }
 0x1c8   :  { %968 = vmatpush.msra.mxu1 %v2074_v24  ;;  %988 = vmatpush.msra.mxu2 %v2223_v62 }
 0x1c9   :  { %895 = vmatpush.msra.mxu0 %v2143_v45 }
 0x1ca   :  { %969 = vmatpush.msra.mxu1 %v2085_v27  ;;  %989 = vmatpush.msra.mxu2 %v2921_v1 }
 0x1cb   :  { %896 = vmatpush.msra.mxu0 %v2922_v3 }
 0x1cc   :  { %970 = vmatpush.msra.mxu1 %v2923_v5  ;;  %990 = vmatpush.msra.mxu2 %v2924_v7 }
 0x1cd   :  { %897 = vmatpush.msra.mxu0 %v2925_v9 }
 0x1ce   :  { %971 = vmatpush.msra.mxu1 %v2926_v10  ;;  %991 = vmatpush.msra.mxu2 %v2927_v11 }
 0x1cf   :  { %898 = vmatpush.msra.mxu0 %v2928_v12  ;;  %v2565_v12 = vld [vmem:[#allocation6 + $0x178] sm:$0xff] }
 0x1d0   :  { %972 = vmatpush.msra.mxu1 %v2929_v13  ;;  %992 = vmatpush.msra.mxu2 %v2930_v14  ;;  %v2568_v13 = vld [vmem:[#allocation6 + $0x168] sm:$0xff] }
 0x22d   :  { %v632_v19 = vpop.f32.mrf.mxu0  ;;  %v652_v20 = vpop.f32.mrf.mxu1 }
 0x22e   :  { %v675_v22 = vadd.f32 %v632_v19, %v2933_v21  ;;  %v676_v23 = vadd.f32 %v652_v20, %v247_v18  ;;  %v2577_v18 = vld [vmem:[#allocation6 + $0x150] sm:$0xff]  ;;  %v2580_v19 = vld [vmem:[#allocation6 + $0x158] sm:$0xff]  ;;  %v2583_v20 = vld [vmem:[#allocation6 + $0x148] sm:$0xff] }
 0x22f   :  { %v2586_v21 = vld [vmem:[#allocation6 + $0x138] sm:$0xff] }
 0x230   :  { %v1557_v24 = vmul.f32 -1.442695, %v675_v22  ;;  %v1558_v26 = vmul.f32 -1.442695, %v676_v23  ;;  %v2590_v22 = vld [vmem:[#allocation6 + $0x130] sm:$0xff]  ;;  %v2593_v23 = vld [vmem:[#allocation6 + $0x120] sm:$0xff] }
 0x232   :  { %1609 = vpow2.f32 %v1557_v24  ;;  %v2597_v24 = vld [vmem:[#allocation6 + $0x118] sm:$0xff] }
 0x233   :  { %1611 = vpow2.f32 %v1558_v26  ;;  %v2600_v26 = vld [vmem:[#allocation6 + $0x108] sm:$0xff] }
 0x234   :  { %v672_v55 = vpop.f32.mrf.mxu2 }
 0x235   :  { %v715_v37 = vadd.f32 %v2412_v35, %v672_v55 }
 0x238   :  { %v1610_v27 = vpop.eup %1609 }
 0x239   :  { %v1612_v28 = vpop.eup %1611  ;;  %v683_v29 = vadd.f32 1.0, %v1610_v27  ;;  %v2607_v27 = vld [vmem:[#allocation6 + $0xf0] sm:$0xff] }
 0x23a   :  { %v684_v31 = vadd.f32 1.0, %v1612_v28  ;;  %v2614_v28 = vld [vmem:[#allocation6 + $0xd8] sm:$0xff] }
 0x23b   :  { %1613 = vrcp.f32 %v683_v29  ;;  %v696_v0 = vand.u32 2147483648, %v683_v29  ;;  %v694_v6 = vand.u32 2147483647, %v683_v29  ;;  %vm690_vm3 = vweird.f32 %v683_v29 }
 0x23c   :  { %1615 = vrcp.f32 %v684_v31  ;;  %v711_v30 = vand.u32 2147483648, %v684_v31  ;;  %vm705_vm7 = vweird.f32 %v684_v31  ;;  %v709_v53 = vand.u32 2147483647, %v684_v31 }
 0x23d   :  { %v697_v44 = vor.u32 1.1754944e-38, %v696_v0  ;;  %vm695_vm5 = vcmp.eq.f32.partialorder %v694_v6, 8.507059e+37  ;;  %v2677_v0 = vld [vmem:[#allocation6] sm:$0xff] }
 0x23e   :  { %v712_v51 = vor.u32 1.1754944e-38, %v711_v30  ;;  %vm710_vm9 = vcmp.eq.f32.partialorder %v709_v53, 8.507059e+37 }
 0x241   :  { %v1614_v36 = vpop.eup %1613 }
 0x242   :  { %v1616_v38 = vpop.eup %1615  ;;  %v686_v40 = vmul.f32 %v1614_v36, %v683_v29  ;;  %vm691_vm2 = vweird.f32 %v1614_v36  ;;  %v2621_v29 = vld [vmem:[#allocation6 + $0xc0] sm:$0xff] }
 0x243   :  { %v701_v42 = vmul.f32 %v1616_v38, %v684_v31  ;;  %vm692_vm4 = vmor %vm690_vm3, %vm691_vm2  ;;  %vm706_vm6 = vweird.f32 %v1616_v38  ;;  %v2628_v31 = vld [vmem:[#allocation6 + $0xa8] sm:$0xff] }
 0x244   :  { %v687_v45 = vsub.f32 1.0, %v686_v40  ;;  %vm707_vm8 = vmor %vm705_vm7, %vm706_vm6  ;;  %v2649_v40 = vld [vmem:[#allocation6 + $0x60] sm:$0xff] }
 0x245   :  { %v702_v49 = vsub.f32 1.0, %v701_v42  ;;  %v2656_v42 = vld [vmem:[#allocation6 + $0x48] sm:$0xff] }
 0x246   :  { %v688_v48 = vmul.f32 %v1614_v36, %v687_v45  ;;  %v2663_v45 = vld [vmem:[#allocation6 + $0x30] sm:$0xff] }
 0x247   :  { %v703_v41 = vmul.f32 %v1616_v38, %v702_v49  ;;  %v2670_v49 = vld [vmem:[#allocation6 + $0x18] sm:$0xff] }
 0x248   :  { %v689_v39 = vadd.f32 %v1614_v36, %v688_v48 }
 0x249   :  { %v704_v43 = vadd.f32 %v1616_v38, %v703_v41 }
 0x24a   :  { %v693_v25 = vsel %vm692_vm4, %v1614_v36, %v689_v39  ;;  %v2635_v36 = vld [vmem:[#allocation6 + $0x90] sm:$0xff] }
 0x24b   :  { %v698_v4 = vsel %vm695_vm5, %v697_v44, %v693_v25  ;;  %v708_v58 = vsel %vm707_vm8, %v1616_v38, %v704_v43  ;;  %v2642_v38 = vld [vmem:[#allocation6 + $0x78] sm:$0xff]  ;;  %v2936_v44 = vld [vmem:[#allocation32_spill] sm:$0xff] }
 0x24c   :  { %v716_v33 = vmul.f32 %v715_v37, %v698_v4  ;;  %v713_v63 = vsel %vm710_vm9, %v712_v51, %v708_v58 }
 0x24d   :  { %v719_v8 = vsub.f32 1.0, %v713_v63  ;;  %v721_v9 = vmul.f32 %v713_v63, %v2500_v34  ;;  %v2574_v34 = vld [vmem:[#allocation6 + $0x160] sm:$0xff] }
 0x24e   :  { %v717_v2 = vadd.f32 %v716_v33, %v288_v17 }
 0x250   :  { %1617 = vtanh.f32 %v717_v2 }
 0x256   :  { %v1618_v3 = vpop.eup %1617 }
 0x257   :  { %v720_v5 = vmul.f32 %v1618_v3, %v719_v8 }
 0x259   :  { %v2560_v10 = vadd.f32 %v721_v9, %v720_v5 }
 0x25b   :  { %745 = vmatmul.f32.vlgmr.msrb.gmra.mxu3 %v2560_v10  ;;  %765 = vmatmul.f32.vlgmr.msrb.gmra.mxu0 %v2560_v10 }
 0x25c   :  { %785 = vmatmul.f32.vlgmr.msrb.gmra.mxu1 %v2560_v10  ;;  %997 = vmatpush.msrb.mxu3 %v2565_v12 }
 0x25d   :  { %1071 = vmatpush.msrb.mxu0 %v2568_v13  ;;  %1091 = vmatpush.msrb.mxu1 %v2571_v16 }
 0x25e   :  { %998 = vmatpush.msrb.mxu3 %v2574_v34 }
 0x25f   :  { %1072 = vmatpush.msrb.mxu0 %v2577_v18  ;;  %1092 = vmatpush.msrb.mxu1 %v2580_v19 }
 0x260   :  { %999 = vmatpush.msrb.mxu3 %v2583_v20 }
 0x261   :  { %1073 = vmatpush.msrb.mxu0 %v2586_v21  ;;  %1093 = vmatpush.msrb.mxu1 %v2148_v47  ;;  %v2604_v47 = vld [vmem:[#allocation6 + $0x100] sm:$0xff] }
 0x262   :  { %1000 = vmatpush.msrb.mxu3 %v2590_v22 }
 0x263   :  { %1074 = vmatpush.msrb.mxu0 %v2593_v23  ;;  %1094 = vmatpush.msrb.mxu1 %v2157_v50  ;;  %v2611_v50 = vld [vmem:[#allocation6 + $0xe8] sm:$0xff] }
 0x264   :  { %1001 = vmatpush.msrb.mxu3 %v2597_v24 }
 0x265   :  { %1075 = vmatpush.msrb.mxu0 %v2600_v26  ;;  %1095 = vmatpush.msrb.mxu1 %v2168_v52  ;;  %v2618_v52 = vld [vmem:[#allocation6 + $0xd0] sm:$0xff] }
 0x266   :  { %1002 = vmatpush.msrb.mxu3 %v2604_v47 }
 0x267   :  { %1076 = vmatpush.msrb.mxu0 %v2607_v27  ;;  %1096 = vmatpush.msrb.mxu1 %v2178_v54  ;;  %v2625_v54 = vld [vmem:[#allocation6 + $0xb8] sm:$0xff] }
 0x268   :  { %1003 = vmatpush.msrb.mxu3 %v2611_v50 }
 0x269   :  { %1077 = vmatpush.msrb.mxu0 %v2614_v28  ;;  %1097 = vmatpush.msrb.mxu1 %v2185_v56  ;;  %v2632_v56 = vld [vmem:[#allocation6 + $0xa0] sm:$0xff] }
 0x26a   :  { %1004 = vmatpush.msrb.mxu3 %v2618_v52 }
 0x26b   :  { %1078 = vmatpush.msrb.mxu0 %v2621_v29  ;;  %1098 = vmatpush.msrb.mxu1 %v2191_v57  ;;  %v2639_v57 = vld [vmem:[#allocation6 + $0x88] sm:$0xff] }
 0x26c   :  { %1005 = vmatpush.msrb.mxu3 %v2625_v54 }
 0x26d   :  { %1079 = vmatpush.msrb.mxu0 %v2628_v31  ;;  %1099 = vmatpush.msrb.mxu1 %v2203_v59  ;;  %v2646_v59 = vld [vmem:[#allocation6 + $0x70] sm:$0xff] }
 0x26e   :  { %1006 = vmatpush.msrb.mxu3 %v2632_v56 }
 0x26f   :  { %1080 = vmatpush.msrb.mxu0 %v2635_v36  ;;  %1100 = vmatpush.msrb.mxu1 %v2212_v60  ;;  %v2653_v60 = vld [vmem:[#allocation6 + $0x58] sm:$0xff] }
 0x270   :  { %1007 = vmatpush.msrb.mxu3 %v2639_v57 }
 0x271   :  { %1081 = vmatpush.msrb.mxu0 %v2642_v38  ;;  %1101 = vmatpush.msrb.mxu1 %v2217_v61  ;;  %v2660_v61 = vld [vmem:[#allocation6 + $0x40] sm:$0xff] }
 0x272   :  { %1008 = vmatpush.msrb.mxu3 %v2646_v59 }
 0x273   :  { %1082 = vmatpush.msrb.mxu0 %v2649_v40  ;;  %1102 = vmatpush.msrb.mxu1 %v2223_v62  ;;  %v2667_v62 = vld [vmem:[#allocation6 + $0x28] sm:$0xff] }
 0x274   :  { %1009 = vmatpush.msrb.mxu3 %v2653_v60 }
 0x275   :  { %1083 = vmatpush.msrb.mxu0 %v2656_v42  ;;  %1103 = vmatpush.msrb.mxu1 %v2921_v1  ;;  %v2674_v1 = vld [vmem:[#allocation6 + $0x10] sm:$0xff] }
 0x276   :  { %1010 = vmatpush.msrb.mxu3 %v2660_v61 }
 0x277   :  { %1084 = vmatpush.msrb.mxu0 %v2663_v45  ;;  %1104 = vmatpush.msrb.mxu1 %v2924_v7  ;;  %v2935_v7 = vld [vmem:[#allocation40_spill] sm:$0xff] }
 0x278   :  { %1011 = vmatpush.msrb.mxu3 %v2667_v62  ;;  %v250_v48 = vadd.f32 %v2935_v7, %v2931_v15 }
 0x279   :  { %1085 = vmatpush.msrb.mxu0 %v2670_v49  ;;  %1105 = vmatpush.msrb.mxu1 %v2927_v11 }
 0x27a   :  { %1012 = vmatpush.msrb.mxu3 %v2674_v1 }
 0x27b   :  { %1086 = vmatpush.msrb.mxu0 %v2677_v0  ;;  %1106 = vmatpush.msrb.mxu1 %v2930_v14 }
 0x2d8   :  { %v766_v6 = vpop.f32.mrf.mxu0 }
 0x2d9   :  { %v790_v41 = vadd.f32 %v766_v6, %v250_v48  ;;  %v786_v3 = vpop.f32.mrf.mxu1 }
 0x2da   :  { %v829_v7 = vadd.f32 %v2412_v35, %v786_v3 }
 0x2db   :  { %v1560_v55 = vmul.f32 -1.442695, %v790_v41 }
 0x2dd   :  { %1619 = vpow2.f32 %v1560_v55  ;;  %v2937_v55 = vld [vmem:[#allocation41_spill] sm:$0xff] }
 0x2de   :  { %v746_v39 = vpop.f32.mrf.mxu3 }
 0x2df   :  { %v789_v11 = vadd.f32 %v746_v39, %v2936_v44  ;;  %v291_v39 = vadd.f32 %v2937_v55, %v2415_v46 }
 0x2e1   :  { %v1559_v25 = vmul.f32 -1.442695, %v789_v11 }
 0x2e3   :  { %v1620_v37 = vpop.eup %1619  ;;  %1621 = vpow2.f32 %v1559_v25 }
 0x2e4   :  { %v798_v4 = vadd.f32 1.0, %v1620_v37 }
 0x2e6   :  { %1623 = vrcp.f32 %v798_v4  ;;  %v825_v44 = vand.u32 2147483648, %v798_v4  ;;  %vm819_vm15 = vweird.f32 %v798_v4  ;;  %v823_v25 = vand.u32 2147483647, %v798_v4 }
 0x2e8   :  { %vm824_vm2 = vcmp.eq.f32.partialorder %v823_v25, 8.507059e+37 }
 0x2e9   :  { %v1622_v43 = vpop.eup %1621 }
 0x2ea   :  { %v797_v32 = vadd.f32 1.0, %v1622_v43 }
 0x2ec   :  { %1625 = vrcp.f32 %v797_v32  ;;  %v1624_v17 = vpop.eup %1623  ;;  %v810_v58 = vand.u32 2147483648, %v797_v32  ;;  %v808_v63 = vand.u32 2147483647, %v797_v32  ;;  %vm804_vm11 = vweird.f32 %v797_v32 }
 0x2ed   :  { %v815_v14 = vmul.f32 %v1624_v17, %v798_v4  ;;  %vm820_vm14 = vweird.f32 %v1624_v17  ;;  %v1714_v4 = vld [vmem:[#allocation6 + $0x128] sm:$0xff] }
 0x2ee   :  { %v811_v9 = vor.u32 1.1754944e-38, %v810_v58  ;;  %vm809_vm13 = vcmp.eq.f32.partialorder %v808_v63, 8.507059e+37  ;;  %vm821_vm1 = vmor %vm819_vm15, %vm820_vm14 }
 0x2ef   :  { %v816_v53 = vsub.f32 1.0, %v815_v14 }
 0x2f1   :  { %v817_v8 = vmul.f32 %v1624_v17, %v816_v53 }
 0x2f2   :  { %v1626_v33 = vpop.eup %1625 }
 0x2f3   :  { %v800_v30 = vmul.f32 %v1626_v33, %v797_v32  ;;  %vm805_vm10 = vweird.f32 %v1626_v33  ;;  %v818_v41 = vadd.f32 %v1624_v17, %v817_v8  ;;  %v826_v32 = vor.u32 1.1754944e-38, %v825_v44 }
 0x2f4   :  { %vm806_vm12 = vmor %vm804_vm11, %vm805_vm10 }
 0x2f5   :  { %v801_v2 = vsub.f32 1.0, %v800_v30  ;;  %v822_v43 = vsel %vm821_vm1, %v1624_v17, %v818_v41 }
 0x2f6   :  { %v827_v14 = vsel %vm824_vm2, %v826_v32, %v822_v43 }
 0x2f7   :  { %v802_v51 = vmul.f32 %v1626_v33, %v801_v2  ;;  %v833_v30 = vsub.f32 1.0, %v827_v14  ;;  %v835_v2 = vmul.f32 %v827_v14, %v2560_v10  ;;  %v1713_v10 = vld [vmem:[#allocation6 + $0x140] sm:$0xff] }
 0x2f9   :  { %v803_v5 = vadd.f32 %v1626_v33, %v802_v51 }
 0x2fb   :  { %v807_v48 = vsel %vm806_vm12, %v1626_v33, %v803_v5 }
 0x2fc   :  { %v812_v6 = vsel %vm809_vm13, %v811_v9, %v807_v48 }
 0x2fd   :  { %v830_v11 = vmul.f32 %v829_v7, %v812_v6 }
 0x2ff   :  { %v831_v37 = vadd.f32 %v830_v11, %v291_v39 }
 0x301   :  { %1627 = vtanh.f32 %v831_v37 }
 0x307   :  { %v1628_v33 = vpop.eup %1627 }
 0x308   :  { %v834_v53 = vmul.f32 %v1628_v33, %v833_v30 }
 0x30a   :  { %v2688_v58 = vadd.f32 %v835_v2, %v834_v53 }
 0x30c   :  { %859 = vmatmul.f32.vlgmr.msrb.gmra.mxu2 %v2688_v58  ;;  %879 = vmatmul.f32.vlgmr.msra.gmra.mxu3 %v2688_v58 }
 0x30d   :  { %899 = vmatmul.f32.vlgmr.msra.gmra.mxu0 %v2688_v58  ;;  %1111 = vmatpush.msrb.mxu2 %v2565_v12 }
 0x30e   :  { %1185 = vmatpush.msra.mxu3 %v2568_v13  ;;  %1205 = vmatpush.msra.mxu0 %v2571_v16  ;;  %v1715_v13 = vld [vmem:[#allocation6 + $0x110] sm:$0xff]  ;;  %v1716_v16 = vld [vmem:[#allocation6 + $0xf8] sm:$0xff] }
 0x30f   :  { %1112 = vmatpush.msrb.mxu2 %v2574_v34 }
 0x310   :  { %1186 = vmatpush.msra.mxu3 %v2577_v18  ;;  %1206 = vmatpush.msra.mxu0 %v2580_v19  ;;  %v1717_v18 = vld [vmem:[#allocation6 + $0xe0] sm:$0xff]  ;;  %v1718_v19 = vld [vmem:[#allocation6 + $0xc8] sm:$0xff] }
 0x311   :  { %1113 = vmatpush.msrb.mxu2 %v2583_v20 }
 0x312   :  { %1187 = vmatpush.msra.mxu3 %v2586_v21  ;;  %1207 = vmatpush.msra.mxu0 %v1713_v10  ;;  %v1719_v21 = vld [vmem:[#allocation6 + $0xb0] sm:$0xff]  ;;  %v2940_v10 = vld [vmem:[#allocation43_spill] sm:$0xff] }
 0x313   :  { %1114 = vmatpush.msrb.mxu2 %v2590_v22 }
 0x314   :  { %1188 = vmatpush.msra.mxu3 %v2593_v23  ;;  %1208 = vmatpush.msra.mxu0 %v1714_v4  ;;  %v1720_v23 = vld [vmem:[#allocation6 + $0x98] sm:$0xff]  ;;  %v294_v4 = vadd.f32 %v2940_v10, %v2415_v46 }
 0x315   :  { %1115 = vmatpush.msrb.mxu2 %v2597_v24 }
 0x316   :  { %1189 = vmatpush.msra.mxu3 %v2600_v26  ;;  %1209 = vmatpush.msra.mxu0 %v1715_v13  ;;  %v1721_v26 = vld [vmem:[#allocation6 + $0x80] sm:$0xff] }
 0x317   :  { %1116 = vmatpush.msrb.mxu2 %v2604_v47 }
 0x318   :  { %1190 = vmatpush.msra.mxu3 %v2607_v27  ;;  %1210 = vmatpush.msra.mxu0 %v1716_v16  ;;  %v1722_v27 = vld [vmem:[#allocation6 + $0x68] sm:$0xff] }
 0x319   :  { %1117 = vmatpush.msrb.mxu2 %v2611_v50 }
 0x31a   :  { %1191 = vmatpush.msra.mxu3 %v2614_v28  ;;  %1211 = vmatpush.msra.mxu0 %v1717_v18  ;;  %v1723_v28 = vld [vmem:[#allocation6 + $0x50] sm:$0xff] }
 0x31b   :  { %1118 = vmatpush.msrb.mxu2 %v2618_v52 }
 0x31c   :  { %1192 = vmatpush.msra.mxu3 %v2621_v29  ;;  %1212 = vmatpush.msra.mxu0 %v1718_v19  ;;  %v1724_v29 = vld [vmem:[#allocation6 + $0x38] sm:$0xff] }
 0x31d   :  { %1119 = vmatpush.msrb.mxu2 %v2625_v54 }
 0x31e   :  { %1193 = vmatpush.msra.mxu3 %v2628_v31  ;;  %1213 = vmatpush.msra.mxu0 %v1719_v21  ;;  %v1725_v31 = vld [vmem:[#allocation6 + $0x20] sm:$0xff] }
 0x31f   :  { %1120 = vmatpush.msrb.mxu2 %v2632_v56 }
 0x320   :  { %1194 = vmatpush.msra.mxu3 %v2635_v36  ;;  %1214 = vmatpush.msra.mxu0 %v1720_v23  ;;  %v1726_v36 = vld [vmem:[#allocation6 + $0x8] sm:$0xff] }
 0x321   :  { %1121 = vmatpush.msrb.mxu2 %v2639_v57 }
 0x322   :  { %1195 = vmatpush.msra.mxu3 %v2642_v38  ;;  %1215 = vmatpush.msra.mxu0 %v1721_v26  ;;  %v2938_v38 = vld [vmem:[#allocation42_spill] sm:$0xff] }
 0x323   :  { %1122 = vmatpush.msrb.mxu2 %v2646_v59 }
 0x324   :  { %1196 = vmatpush.msra.mxu3 %v2649_v40  ;;  %1216 = vmatpush.msra.mxu0 %v1722_v27  ;;  %v253_v40 = vadd.f32 %v2938_v38, %v2931_v15 }
 0x325   :  { %1123 = vmatpush.msrb.mxu2 %v2653_v60 }
 0x326   :  { %1197 = vmatpush.msra.mxu3 %v2656_v42  ;;  %1217 = vmatpush.msra.mxu0 %v1723_v28 }
 0x327   :  { %1124 = vmatpush.msrb.mxu2 %v2660_v61 }
 0x328   :  { %1198 = vmatpush.msra.mxu3 %v2663_v45  ;;  %1218 = vmatpush.msra.mxu0 %v1724_v29  ;;  %v2939_v45 = vld [vmem:[#allocation33_spill] sm:$0xff] }
 0x329   :  { %1125 = vmatpush.msrb.mxu2 %v2667_v62 }
 0x32a   :  { %1199 = vmatpush.msra.mxu3 %v2670_v49  ;;  %1219 = vmatpush.msra.mxu0 %v1725_v31 }
 0x32b   :  { %1126 = vmatpush.msrb.mxu2 %v2674_v1 }
 0x32c   :  { %1200 = vmatpush.msra.mxu3 %v2677_v0  ;;  %1220 = vmatpush.msra.mxu0 %v1726_v36 }
 0x38a   :  { %v900_v37 = vpop.f32.mrf.mxu0 }
 0x38b   :  { %v943_v30 = vadd.f32 %v2412_v35, %v900_v37 }
 0x38f   :  { %v860_v42 = vpop.f32.mrf.mxu2  ;;  %v880_v17 = vpop.f32.mrf.mxu3 }
 0x390   :  { %v903_v51 = vadd.f32 %v860_v42, %v2939_v45  ;;  %v904_v63 = vadd.f32 %v880_v17, %v253_v40 }
 0x392   :  { %v1561_v8 = vmul.f32 -1.442695, %v903_v51  ;;  %v1562_v3 = vmul.f32 -1.442695, %v904_v63 }
 0x394   :  { %1629 = vpow2.f32 %v1561_v8 }
 0x395   :  { %1631 = vpow2.f32 %v1562_v3  ;;  %v2758_v3 = vld [vmem:[#allocation8] ss:$0 sm:$0xff] }
 0x39a   :  { %v1630_v49 = vpop.eup %1629 }
 0x39b   :  { %v1632_v5 = vpop.eup %1631  ;;  %v911_v9 = vadd.f32 1.0, %v1630_v49 }
 0x39c   :  { %v912_v7 = vadd.f32 1.0, %v1632_v5  ;;  %v2943_v5 = vld [vmem:[#allocation45_spill] sm:$0xff] }
 0x39d   :  { %1633 = vrcp.f32 %v911_v9  ;;  %v924_v39 = vand.u32 2147483648, %v911_v9  ;;  %v922_v25 = vand.u32 2147483647, %v911_v9  ;;  %vm918_vm4 = vweird.f32 %v911_v9 }
 0x39e   :  { %1635 = vrcp.f32 %v912_v7  ;;  %v939_v13 = vand.u32 2147483648, %v912_v7  ;;  %vm933_vm8 = vweird.f32 %v912_v7  ;;  %v937_v18 = vand.u32 2147483647, %v912_v7 }
 0x39f   :  { %v925_v14 = vor.u32 1.1754944e-38, %v924_v39  ;;  %vm923_vm6 = vcmp.eq.f32.partialorder %v922_v25, 8.507059e+37 }
 0x3a0   :  { %v940_v23 = vor.u32 1.1754944e-38, %v939_v13  ;;  %vm938_vm10 = vcmp.eq.f32.partialorder %v937_v18, 8.507059e+37 }
 0x3a3   :  { %v1634_v0 = vpop.eup %1633 }
 0x3a4   :  { %v1636_v48 = vpop.eup %1635  ;;  %v914_v6 = vmul.f32 %v1634_v0, %v911_v9  ;;  %vm919_vm3 = vweird.f32 %v1634_v0  ;;  %v297_v9 = vadd.f32 %v2943_v5, %v2415_v46 }
 0x3a5   :  { %v929_v41 = vmul.f32 %v1636_v48, %v912_v7  ;;  %vm920_vm5 = vmor %vm918_vm4, %vm919_vm3  ;;  %vm934_vm7 = vweird.f32 %v1636_v48 }
 0x3a6   :  { %v915_v55 = vsub.f32 1.0, %v914_v6  ;;  %vm935_vm9 = vmor %vm933_vm8, %vm934_vm7 }
 0x3a7   :  { %v930_v44 = vsub.f32 1.0, %v929_v41 }
 0x3a8   :  { %v916_v11 = vmul.f32 %v1634_v0, %v915_v55 }
 0x3a9   :  { %v931_v43 = vmul.f32 %v1636_v48, %v930_v44 }
 0x3aa   :  { %v917_v32 = vadd.f32 %v1634_v0, %v916_v11 }
 0x3ab   :  { %v932_v2 = vadd.f32 %v1636_v48, %v931_v43 }
 0x3ac   :  { %v921_v33 = vsel %vm920_vm5, %v1634_v0, %v917_v32 }
 0x3ad   :  { %v926_v53 = vsel %vm923_vm6, %v925_v14, %v921_v33  ;;  %v936_v21 = vsel %vm935_vm9, %v1636_v48, %v932_v2  ;;  %v2944_v33 = vld [vmem:[#allocation46_spill] sm:$0xff] }
 0x3ae   :  { %v944_v16 = vmul.f32 %v943_v30, %v926_v53  ;;  %v941_v26 = vsel %vm938_vm10, %v940_v23, %v936_v21  ;;  %v259_v53 = vadd.f32 %v2944_v33, %v2931_v15  ;;  %v1304_v21 = vld [vmem:[#allocation9 + $0x50] sm:$0xff]  ;;  %v1301_v23 = vld [vmem:[#allocation9 + $0x38] sm:$0xff] }
 0x3af   :  { %v947_v35 = vsub.f32 1.0, %v941_v26  ;;  %v949_v29 = vmul.f32 %v941_v26, %v2688_v58  ;;  %v1298_v26 = vld [vmem:[#allocation9 + $0x20] sm:$0xff]  ;;  %v1439_v33 = vld [vmem:[#allocation11 + $0x78] sm:$0xff] }
 0x3b0   :  { %v945_v19 = vadd.f32 %v944_v16, %v294_v4  ;;  %v2945_v4 = vld [vmem:[#allocation35_spill] sm:$0xff] }
 0x3b2   :  { %1637 = vtanh.f32 %v945_v19 }
 0x3b8   :  { %v1638_v27 = vpop.eup %1637 }
 0x3b9   :  { %v948_v28 = vmul.f32 %v1638_v27, %v947_v35  ;;  %v1295_v35 = vld [vmem:[#allocation9 + $0x8] sm:$0xff]  ;;  %v2775_v27 = vld [vmem:[%s2850_s0 + $0x38] sm:$0xff] }
 0x3bb   :  { %v2734_v31 = vadd.f32 %v949_v29, %v948_v28 }
 0x3bd   :  { %973 = vmatmul.f32.vlgmr.msra.gmra.mxu1 %v2734_v31  ;;  %993 = vmatmul.f32.vlgmr.msra.gmra.mxu2 %v2734_v31 }
 0x3be   :  { %1013 = vmatmul.f32.vlgmr.msrb.gmra.mxu3 %v2734_v31  ;;  %1225 = vmatpush.msra.mxu1 %v2565_v12 }
 0x3bf   :  { %1349 = vmatpush.msra.mxu2 %v1304_v21  ;;  %1476 = vmatpush.msrb.mxu3 %v1439_v33  ;;  %v1451_v21 = vld [vmem:[#allocation12 + $0x58] sm:$0xff] }
 0x3c0   :  { %1226 = vmatpush.msra.mxu1 %v2574_v34  ;;  %v2941_v34 = vld [vmem:[#allocation34_spill] sm:$0xff] }
 0x3c1   :  { %1350 = vmatpush.msra.mxu2 %v1301_v23  ;;  %v1435_v23 = vld [vmem:[#allocation11 + $0x58] sm:$0xff] }
 0x3c2   :  { %1227 = vmatpush.msra.mxu1 %v2583_v20 }
 0x3c3   :  { %1351 = vmatpush.msra.mxu2 %v1298_v26  ;;  %v2947_v26 = vld [vmem:[#allocation48_spill] sm:$0xff] }
 0x3c4   :  { %1228 = vmatpush.msra.mxu1 %v2590_v22 }
 0x3c5   :  { %1352 = vmatpush.msra.mxu2 %v1295_v35  ;;  %v262_v35 = vadd.f32 %v2947_v26, %v2931_v15 }
 0x3c6   :  { %1229 = vmatpush.msra.mxu1 %v2597_v24  ;;  %v2942_v24 = vld [vmem:[#allocation44_spill] sm:$0xff] }
 0x3c8   :  { %1230 = vmatpush.msra.mxu1 %v2604_v47  ;;  %v256_v47 = vadd.f32 %v2942_v24, %v2931_v15  ;;  %v1294_v24 = vld [vmem:[#allocation9] sm:$0xff] }
 0x3ca   :  { %1231 = vmatpush.msra.mxu1 %v2611_v50 }
 0x3cc   :  { %1232 = vmatpush.msra.mxu1 %v2618_v52 }
 0x3ce   :  { %1233 = vmatpush.msra.mxu1 %v2625_v54 }
 0x3d0   :  { %1234 = vmatpush.msra.mxu1 %v2632_v56 }
 0x3d2   :  { %1235 = vmatpush.msra.mxu1 %v2639_v57 }
 0x3d4   :  { %1236 = vmatpush.msra.mxu1 %v2646_v59 }
 0x3d6   :  { %1237 = vmatpush.msra.mxu1 %v2653_v60 }
 0x3d8   :  { %1238 = vmatpush.msra.mxu1 %v2660_v61 }
 0x3da   :  { %1239 = vmatpush.msra.mxu1 %v2667_v62 }
 0x3dc   :  { %1240 = vmatpush.msra.mxu1 %v2674_v1 }
 0x43a   :  { %v974_v12 = vpop.f32.mrf.mxu1 }
 0x43b   :  { %v1017_v20 = vadd.f32 %v974_v12, %v2941_v34  ;;  %v1303_v34 = vld [vmem:[#allocation9 + $0x48] sm:$0xff] }
 0x43d   :  { %v1563_v22 = vmul.f32 -1.442695, %v1017_v20  ;;  %v1300_v20 = vld [vmem:[#allocation9 + $0x30] sm:$0xff] }
 0x43f   :  { %1639 = vpow2.f32 %v1563_v22  ;;  %v1297_v22 = vld [vmem:[#allocation9 + $0x18] sm:$0xff] }
 0x440   :  { %v994_v50 = vpop.f32.mrf.mxu2 }
 0x441   :  { %v1018_v52 = vadd.f32 %v994_v50, %v256_v47  ;;  %v1014_v42 = vpop.f32.mrf.mxu3 }
 0x442   :  { %v1057_v49 = vadd.f32 %v2758_v3, %v1014_v42 }
 0x443   :  { %v1564_v54 = vmul.f32 -1.442695, %v1018_v52 }
 0x445   :  { %v1640_v56 = vpop.eup %1639  ;;  %1641 = vpow2.f32 %v1564_v54 }
 0x446   :  { %v1025_v57 = vadd.f32 1.0, %v1640_v56  ;;  %v1305_v56 = vld [vmem:[#allocation9 + $0x58] sm:$0xff] }
 0x448   :  { %1643 = vrcp.f32 %v1025_v57  ;;  %v1038_v58 = vand.u32 2147483648, %v1025_v57  ;;  %v1036_v38 = vand.u32 2147483647, %v1025_v57  ;;  %vm1032_vm12 = vweird.f32 %v1025_v57 }
 0x44a   :  { %v1039_v51 = vor.u32 1.1754944e-38, %v1038_v58  ;;  %vm1037_vm14 = vcmp.eq.f32.partialorder %v1036_v38, 8.507059e+37 }
 0x44b   :  { %v1642_v59 = vpop.eup %1641 }
 0x44c   :  { %v1026_v60 = vadd.f32 1.0, %v1642_v59 }
 0x44e   :  { %v1644_v61 = vpop.eup %1643  ;;  %1645 = vrcp.f32 %v1026_v60  ;;  %v1053_v6 = vand.u32 2147483648, %v1026_v60  ;;  %v1051_v41 = vand.u32 2147483647, %v1026_v60  ;;  %vm1047_vm1 = vweird.f32 %v1026_v60 }
 0x44f   :  { %v1028_v62 = vmul.f32 %v1644_v61, %v1025_v57  ;;  %vm1033_vm11 = vweird.f32 %v1644_v61  ;;  %v1302_v57 = vld [vmem:[#allocation9 + $0x40] sm:$0xff] }
 0x450   :  { %vm1034_vm13 = vmor %vm1032_vm12, %vm1033_vm11  ;;  %v1054_v11 = vor.u32 1.1754944e-38, %v1053_v6  ;;  %vm1052_vm3 = vcmp.eq.f32.partialorder %v1051_v41, 8.507059e+37 }
 0x451   :  { %v1029_v1 = vsub.f32 1.0, %v1028_v62  ;;  %v1299_v62 = vld [vmem:[#allocation9 + $0x28] sm:$0xff] }
 0x453   :  { %v1030_v36 = vmul.f32 %v1644_v61, %v1029_v1 }
 0x454   :  { %v1646_v40 = vpop.eup %1645 }
 0x455   :  { %v1043_v17 = vmul.f32 %v1646_v40, %v1026_v60  ;;  %v1031_v45 = vadd.f32 %v1644_v61, %v1030_v36  ;;  %vm1048_vm15 = vweird.f32 %v1646_v40 }
 0x456   :  { %vm1049_vm2 = vmor %vm1047_vm1, %vm1048_vm15 }
 0x457   :  { %v1044_v63 = vsub.f32 1.0, %v1043_v17  ;;  %v1035_v8 = vsel %vm1034_vm13, %v1644_v61, %v1031_v45 }
 0x458   :  { %v1040_v7 = vsel %vm1037_vm14, %v1039_v51, %v1035_v8 }
 0x459   :  { %v1045_v0 = vmul.f32 %v1646_v40, %v1044_v63  ;;  %v1058_v48 = vmul.f32 %v1057_v49, %v1040_v7  ;;  %v2946_v49 = vld [vmem:[#allocation47_spill] sm:$0xff] }
 0x45a   :  { %v300_v5 = vadd.f32 %v2946_v49, %v2415_v46  ;;  %v1442_v49 = vld [vmem:[#allocation12 + $0x10] sm:$0xff] }
 0x45b   :  { %v1059_v55 = vadd.f32 %v1058_v48, %v297_v9  ;;  %v1046_v39 = vadd.f32 %v1646_v40, %v1045_v0 }
 0x45d   :  { %1647 = vtanh.f32 %v1059_v55  ;;  %v1050_v44 = vsel %vm1049_vm2, %v1646_v40, %v1046_v39  ;;  %v1296_v40 = vld [vmem:[#allocation9 + $0x10] sm:$0xff] }
 0x45e   :  { %v1055_v25 = vsel %vm1052_vm3, %v1054_v11, %v1050_v44 }
 0x45f   :  { %v1061_v37 = vsub.f32 1.0, %v1055_v25  ;;  %v1063_v14 = vmul.f32 %v1055_v25, %v2734_v31 }
 0x463   :  { %v1648_v43 = vpop.eup %1647 }
 0x464   :  { %v1062_v32 = vmul.f32 %v1648_v43, %v1061_v37  ;;  %v2795_v43 = vld [vmem:[%s2856_s6] sm:$0x7] }
 0x465   :  { %v1308_v15 = vperm.slane %v2795_v43, 0 }
 0x466   :  { %v2764_v30 = vadd.f32 %v1063_v14, %v1062_v32  ;;  %v1309_v32 = vperm.slane %v2795_v43, 1 }
 0x468   :  { %1087 = vmatmul.f32.vlgmr.msrb.gmra.mxu0 %v2764_v30  ;;  %1107 = vmatmul.f32.vlgmr.msrb.gmra.mxu1 %v2764_v30 }
 0x469   :  { %1127 = vmatmul.f32.vlgmr.msrb.gmra.mxu2 %v2764_v30  ;;  %1329 = vmatpush.msrb.mxu0 %v1303_v34  ;;  %v1433_v34 = vld [vmem:[#allocation11 + $0x48] sm:$0xff] }
 0x46a   :  { %1369 = vmatpush.msrb.mxu2 %v1305_v56  ;;  %v2948_v56 = vld [vmem:[#allocation37_spill] sm:$0xff] }
 0x46b   :  { %1330 = vmatpush.msrb.mxu0 %v1300_v20 }
 0x46c   :  { %1370 = vmatpush.msrb.mxu2 %v1302_v57 }
 0x46d   :  { %1331 = vmatpush.msrb.mxu0 %v1297_v22  ;;  %v1448_v22 = vld [vmem:[#allocation12 + $0x40] sm:$0xff] }
 0x46e   :  { %1371 = vmatpush.msrb.mxu2 %v1299_v62  ;;  %v1430_v62 = vld [vmem:[#allocation11 + $0x30] sm:$0xff] }
 0x46f   :  { %1332 = vmatpush.msrb.mxu0 %v1294_v24  ;;  %v1432_v24 = vld [vmem:[#allocation11 + $0x40] sm:$0xff] }
 0x470   :  { %1372 = vmatpush.msrb.mxu2 %v1296_v40 }
 0x471   :  { %1570 = vmatmul.msk.f32.vlgmr.msra.gmra.mxu2 %vm157_vm0, %v2775_v27 }
 0x479   :  { %1571 = vmatmul.msk.f32.vlgmr.msrb.gmra.mxu2 %vm157_vm0, %v2775_v27 }
 0x4e5   :  { %v1088_v2 = vpop.f32.mrf.mxu0  ;;  %v1108_v10 = vpop.f32.mrf.mxu1 }
 0x4e6   :  { %v1131_v13 = vadd.f32 %v1088_v2, %v2945_v4  ;;  %v1132_v16 = vadd.f32 %v1108_v10, %v259_v53  ;;  %v1454_v2 = vld [vmem:[#allocation12 + $0x70] sm:$0xff]  ;;  %v1453_v4 = vld [vmem:[#allocation12 + $0x68] sm:$0xff] }
 0x4e7   :  { %v1438_v10 = vld [vmem:[#allocation11 + $0x70] sm:$0xff] }
 0x4e8   :  { %v1565_v18 = vmul.f32 -1.442695, %v1131_v13  ;;  %v1566_v19 = vmul.f32 -1.442695, %v1132_v16  ;;  %1477 = vmatpush.msrb.mxu3 %v1438_v10  ;;  %v1437_v13 = vld [vmem:[#allocation11 + $0x68] sm:$0xff] }
 0x4ea   :  { %1649 = vpow2.f32 %v1565_v18  ;;  %1478 = vmatpush.msrb.mxu3 %v1437_v13  ;;  %v1452_v18 = vld [vmem:[#allocation12 + $0x60] sm:$0xff] }
 0x4eb   :  { %1651 = vpow2.f32 %v1566_v19  ;;  %v1436_v19 = vld [vmem:[#allocation11 + $0x60] sm:$0xff] }
 0x4ec   :  { %v1128_v38 = vpop.f32.mrf.mxu2  ;;  %1479 = vmatpush.msrb.mxu3 %v1436_v19 }
 0x4ed   :  { %v1171_v51 = vadd.f32 %v2758_v3, %v1128_v38  ;;  %v1429_v38 = vld [vmem:[#allocation11 + $0x28] sm:$0xff] }
 0x4ee   :  { %1480 = vmatpush.msrb.mxu3 %v1435_v23 }
 0x4f0   :  { %v1650_v28 = vpop.eup %1649 }
 0x4f1   :  { %v1652_v29 = vpop.eup %1651  ;;  %v1139_v31 = vadd.f32 1.0, %v1650_v28  ;;  %v1434_v28 = vld [vmem:[#allocation11 + $0x50] sm:$0xff] }
 0x4f2   :  { %v1140_v12 = vadd.f32 1.0, %v1652_v29  ;;  %1481 = vmatpush.msrb.mxu3 %v1434_v28 }
 0x4f3   :  { %1653 = vrcp.f32 %v1139_v31  ;;  %v1152_v61 = vand.u32 2147483648, %v1139_v31  ;;  %v1150_v58 = vand.u32 2147483647, %v1139_v31  ;;  %vm1146_vm5 = vweird.f32 %v1139_v31 }
 0x4f4   :  { %1655 = vrcp.f32 %v1140_v12  ;;  %v1167_v7 = vand.u32 2147483648, %v1140_v12  ;;  %vm1161_vm9 = vweird.f32 %v1140_v12  ;;  %v1165_v0 = vand.u32 2147483647, %v1140_v12  ;;  %v1354_v14 = vpop.f32.mrf.mxu2  ;;  %1482 = vmatpush.msrb.mxu3 %v1433_v34 }
 0x4f5   :  { %v1153_v17 = vor.u32 1.1754944e-38, %v1152_v61  ;;  %vm1151_vm7 = vcmp.eq.f32.partialorder %v1150_v58, 8.507059e+37  ;;  %v1355_v53 = vadd.f32 %v1354_v14, %v1309_v32  ;;  %v1446_v61 = vld [vmem:[#allocation12 + $0x30] sm:$0xff] }
 0x4f6   :  { %v1168_v41 = vor.u32 1.1754944e-38, %v1167_v7  ;;  %vm1166_vm11 = vcmp.eq.f32.partialorder %v1165_v0, 8.507059e+37  ;;  %1483 = vmatpush.msrb.mxu3 %v1432_v24  ;;  %v1425_v7 = vld [vmem:[#allocation11 + $0x8] sm:$0xff] }
 0x4f7   :  { %v1573_v16 = vmul.f32 -1.442695, %v1355_v53 }
 0x4f9   :  { %v1654_v47 = vpop.eup %1653 }
 0x4fa   :  { %v1656_v50 = vpop.eup %1655  ;;  %v1142_v52 = vmul.f32 %v1654_v47, %v1139_v31  ;;  %vm1147_vm4 = vweird.f32 %v1654_v47 }
 0x4fb   :  { %v1157_v54 = vmul.f32 %v1656_v50, %v1140_v12  ;;  %vm1148_vm6 = vmor %vm1146_vm5, %vm1147_vm4  ;;  %vm1162_vm8 = vweird.f32 %v1656_v50  ;;  %v1449_v12 = vld [vmem:[#allocation12 + $0x48] sm:$0xff] }
 0x4fc   :  { %v1143_v59 = vsub.f32 1.0, %v1142_v52  ;;  %vm1163_vm10 = vmor %vm1161_vm9, %vm1162_vm8  ;;  %v1374_v34 = vpop.f32.mrf.mxu2 }
 0x4fd   :  { %v1158_v60 = vsub.f32 1.0, %v1157_v54 }
 0x4fe   :  { %v1144_v1 = vmul.f32 %v1654_v47, %v1143_v59 }
 0x4ff   :  { %v1159_v36 = vmul.f32 %v1656_v50, %v1158_v60 }
 0x500   :  { %v1145_v42 = vadd.f32 %v1654_v47, %v1144_v1 }
 0x501   :  { %v1160_v8 = vadd.f32 %v1656_v50, %v1159_v36  ;;  %v1445_v36 = vld [vmem:[#allocation12 + $0x28] sm:$0xff] }
 0x502   :  { %v1149_v45 = vsel %vm1148_vm6, %v1654_v47, %v1145_v42  ;;  %v1447_v47 = vld [vmem:[#allocation12 + $0x38] sm:$0xff] }
 0x503   :  { %v1154_v63 = vsel %vm1151_vm7, %v1153_v17, %v1149_v45  ;;  %v1164_v6 = vsel %vm1163_vm10, %v1656_v50, %v1160_v8  ;;  %v1431_v50 = vld [vmem:[#allocation11 + $0x38] sm:$0xff]  ;;  %v1444_v45 = vld [vmem:[#allocation12 + $0x20] sm:$0xff] }
 0x504   :  { %v1172_v9 = vmul.f32 %v1171_v51, %v1154_v63  ;;  %v1169_v55 = vsel %vm1166_vm11, %v1168_v41, %v1164_v6  ;;  %1484 = vmatpush.msrb.mxu3 %v1431_v50  ;;  %v1428_v51 = vld [vmem:[#allocation11 + $0x20] sm:$0xff]  ;;  %v1443_v63 = vld [vmem:[#allocation12 + $0x18] sm:$0xff] }
 0x505   :  { %v1175_v39 = vsub.f32 1.0, %v1169_v55  ;;  %v1177_v25 = vmul.f32 %v1169_v55, %v2764_v30  ;;  %v1455_v30 = vld [vmem:[#allocation12 + $0x78] sm:$0xff]  ;;  %v1440_v41 = vld [vmem:[#allocation12] sm:$0xff] }
 0x506   :  { %v1173_v48 = vadd.f32 %v1172_v9, %v300_v5  ;;  %1456 = vmatpush.msra.mxu2 %v1455_v30  ;;  %1485 = vmatpush.msrb.mxu3 %v1430_v62  ;;  %v1427_v8 = vld [vmem:[#allocation11 + $0x18] sm:$0xff]  ;;  %v1426_v5 = vld [vmem:[#allocation11 + $0x10] sm:$0xff]  ;;  %v1441_v9 = vld [vmem:[#allocation12 + $0x8] sm:$0xff] }
 0x507   :  { %v1424_v55 = vld [vmem:[#allocation11] sm:$0xff] }
 0x508   :  { %1657 = vtanh.f32 %v1173_v48  ;;  %1457 = vmatpush.msra.mxu2 %v1454_v2  ;;  %1486 = vmatpush.msrb.mxu3 %v1429_v38 }
 0x509   :  { %1659 = vpow2.f32 %v1573_v16 }
 0x50a   :  { %1458 = vmatpush.msra.mxu2 %v1453_v4  ;;  %1487 = vmatpush.msrb.mxu3 %v1428_v51  ;;  %v2949_v4 = vld [vmem:[#allocation49_spill] sm:$0xff] }
 0x50b   :  { %v303_v13 = vadd.f32 %v2949_v4, %v2415_v46  ;;  %v1310_v46 = vperm.slane %v2795_v43, 2  ;;  %v1587_v43 = vld [vmem:[%s2857_s7] ss:$0 sm:$0xff] }
 0x50c   :  { %1459 = vmatpush.msra.mxu2 %v1452_v18  ;;  %1488 = vmatpush.msrb.mxu3 %v1427_v8 }
 0x50e   :  { %v1658_v44 = vpop.eup %1657  ;;  %1460 = vmatpush.msra.mxu2 %v1451_v21  ;;  %1489 = vmatpush.msrb.mxu3 %v1426_v5 }
 0x50f   :  { %v1176_v11 = vmul.f32 %v1658_v44, %v1175_v39  ;;  %v1660_v52 = vpop.eup %1659 }
 0x510   :  { %v2802_v59 = vadd.f32 1.0, %v1660_v52  ;;  %1490 = vmatpush.msrb.mxu3 %v1425_v7 }
 0x511   :  { %v2785_v37 = vadd.f32 %v1177_v25, %v1176_v11 }
 0x512   :  { %1491 = vmatpush.msrb.mxu3 %v1424_v55  ;;  %v1411_v26 = vand.u32 2147483648, %v2802_v59  ;;  %vm1405_vm12 = vweird.f32 %v2802_v59 }
 0x513   :  { %1201 = vmatmul.f32.vlgmr.msra.gmra.mxu3 %v2785_v37  ;;  %1221 = vmatmul.f32.vlgmr.msra.gmra.mxu0 %v2785_v37 }
 0x514   :  { %1241 = vmatmul.f32.vlgmr.msra.gmra.mxu1 %v2785_v37 }
 0x51b   :  { %1569 = vmatmul.msk.f32.vlgmr.msrb.gmra.mxu0 %vm157_vm0, %v2775_v27  ;;  %v1450_v27 = vld [vmem:[#allocation12 + $0x50] sm:$0xff] }
 0x51c   :  { %1461 = vmatpush.msra.mxu2 %v1450_v27 }
 0x51e   :  { %1462 = vmatpush.msra.mxu2 %v1449_v12 }
 0x520   :  { %1463 = vmatpush.msra.mxu2 %v1448_v22 }
 0x522   :  { %1464 = vmatpush.msra.mxu2 %v1447_v47 }
 0x524   :  { %1465 = vmatpush.msra.mxu2 %v1446_v61 }
 0x526   :  { %1466 = vmatpush.msra.mxu2 %v1445_v36 }
 0x528   :  { %1467 = vmatpush.msra.mxu2 %v1444_v45  ;;  %v1412_v45 = vor.u32 1.1754944e-38, %v1411_v26 }
 0x52a   :  { %1468 = vmatpush.msra.mxu2 %v1443_v63 }
 0x52c   :  { %1469 = vmatpush.msra.mxu2 %v1442_v49 }
 0x52e   :  { %1470 = vmatpush.msra.mxu2 %v1441_v9 }
 0x530   :  { %1471 = vmatpush.msra.mxu2 %v1440_v41 }
 0x590   :  { %v1222_v29 = vpop.f32.mrf.mxu0 }
 0x591   :  { %v1246_v31 = vadd.f32 %v1222_v29, %v262_v35  ;;  %v1242_v27 = vpop.f32.mrf.mxu1 }
 0x592   :  { %v1285_v24 = vadd.f32 %v2758_v3, %v1242_v27 }
 0x593   :  { %v1568_v20 = vmul.f32 -1.442695, %v1246_v31 }
 0x595   :  { %1661 = vpow2.f32 %v1568_v20 }
 0x596   :  { %v1202_v54 = vpop.f32.mrf.mxu3 }
 0x597   :  { %v1245_v57 = vadd.f32 %v1202_v54, %v2948_v56  ;;  %v1375_v54 = vadd.f32 %v1374_v34, %v1310_v46 }
 0x598   :  { %v1334_v60 = vpop.f32.mrf.mxu0 }
 0x599   :  { %v1567_v1 = vmul.f32 -1.442695, %v1245_v57  ;;  %v1335_v58 = vadd.f32 %v1334_v60, %v1308_v15 }
 0x59b   :  { %v1662_v40 = vpop.eup %1661  ;;  %1663 = vpow2.f32 %v1567_v1  ;;  %v1572_v42 = vmul.f32 -1.442695, %v1335_v58  ;;  %v1409_v58 = vand.u32 2147483647, %v2802_v59 }
 0x59c   :  { %v2804_v17 = vadd.f32 1.0, %v1662_v40  ;;  %1665 = vrcp.f32 %v2802_v59 }
 0x59d   :  { %1667 = vpow2.f32 %v1572_v42  ;;  %vm1410_vm11 = vcmp.eq.f32.partialorder %v1409_v58, 8.507059e+37 }
 0x59e   :  { %1669 = vrcp.f32 %v2804_v17  ;;  %v1281_v57 = vand.u32 2147483648, %v2804_v17  ;;  %vm1275_vm6 = vweird.f32 %v2804_v17  ;;  %v1279_v61 = vand.u32 2147483647, %v2804_v17 }
 0x5a0   :  { %v1282_v42 = vor.u32 1.1754944e-38, %v1281_v57  ;;  %vm1280_vm10 = vcmp.eq.f32.partialorder %v1279_v61, 8.507059e+37 }
 0x5a1   :  { %v1664_v0 = vpop.eup %1663 }
 0x5a2   :  { %v2808_v48 = vpop.eup %1665  ;;  %v1253_v6 = vadd.f32 1.0, %v1664_v0 }
 0x5a3   :  { %v1668_v39 = vpop.eup %1667  ;;  %v1401_v25 = vmul.f32 %v2808_v48, %v2802_v59  ;;  %vm1406_vm13 = vweird.f32 %v2808_v48 }
 0x5a4   :  { %1671 = vrcp.f32 %v1253_v6  ;;  %v2810_v44 = vpop.eup %1669  ;;  %v1383_v11 = vadd.f32 1.0, %v1668_v39  ;;  %v1266_v18 = vand.u32 2147483648, %v1253_v6  ;;  %v1264_v23 = vand.u32 2147483647, %v1253_v6  ;;  %vm1407_vm9 = vmor %vm1405_vm12, %vm1406_vm13 }
 0x5a5   :  { %v1271_v32 = vmul.f32 %v2810_v44, %v2804_v17  ;;  %v1402_v30 = vsub.f32 1.0, %v1401_v25  ;;  %vm1260_vm14 = vweird.f32 %v1253_v6  ;;  %vm1276_vm3 = vweird.f32 %v2810_v44 }
 0x5a6   :  { %1673 = vrcp.f32 %v1383_v11  ;;  %v1396_v31 = vand.u32 2147483648, %v1383_v11  ;;  %v1267_v12 = vor.u32 1.1754944e-38, %v1266_v18  ;;  %v1394_v22 = vand.u32 2147483647, %v1383_v11  ;;  %vm1277_vm8 = vmor %vm1275_vm6, %vm1276_vm3 }
 0x5a7   :  { %v1272_v53 = vsub.f32 1.0, %v1271_v32  ;;  %v1403_v16 = vmul.f32 %v2808_v48, %v1402_v30  ;;  %vm1265_vm2 = vcmp.eq.f32.partialorder %v1264_v23, 8.507059e+37  ;;  %vm1390_vm4 = vweird.f32 %v1383_v11 }
 0x5a8   :  { %v1397_v56 = vor.u32 1.1754944e-38, %v1396_v31  ;;  %vm1395_vm7 = vcmp.eq.f32.partialorder %v1394_v22, 8.507059e+37 }
 0x5a9   :  { %v1273_v35 = vmul.f32 %v2810_v44, %v1272_v53  ;;  %v1404_v1 = vadd.f32 %v2808_v48, %v1403_v16 }
 0x5aa   :  { %v1672_v14 = vpop.eup %1671 }
 0x5ab   :  { %v1256_v33 = vmul.f32 %v1672_v14, %v1253_v6  ;;  %vm1261_vm0 = vweird.f32 %v1672_v14  ;;  %v1274_v15 = vadd.f32 %v2810_v44, %v1273_v35  ;;  %v1408_v51 = vsel %vm1407_vm9, %v2808_v48, %v1404_v1  ;;  %v1588_v48 = vld [vmem:[%s2860_s10] ss:$0 sm:$0xff] }
 0x5ac   :  { %v1674_v2 = vpop.eup %1673  ;;  %vm1262_vm15 = vmor %vm1260_vm14, %vm1261_vm0  ;;  %v1413_v8 = vsel %vm1410_vm11, %v1412_v45, %v1408_v51 }
 0x5ad   :  { %v1257_v10 = vsub.f32 1.0, %v1256_v33  ;;  %v1386_v19 = vmul.f32 %v1674_v2, %v1383_v11  ;;  %vm1391_vm1 = vweird.f32 %v1674_v2  ;;  %v1278_v40 = vsel %vm1277_vm8, %v2810_v44, %v1274_v15 }
 0x5ae   :  { %vm1392_vm5 = vmor %vm1390_vm4, %vm1391_vm1  ;;  %v1283_v63 = vsel %vm1280_vm10, %v1282_v42, %v1278_v40  ;;  %v1422_v59 = vsub.f32 1.0, %v1413_v8 }
 0x5af   :  { %v1258_v21 = vmul.f32 %v1672_v14, %v1257_v10  ;;  %v1387_v28 = vsub.f32 1.0, %v1386_v19  ;;  %v1289_v49 = vsub.f32 1.0, %v1283_v63  ;;  %v1291_v7 = vmul.f32 %v1283_v63, %v2785_v37 }
 0x5b1   :  { %v1259_v29 = vadd.f32 %v1672_v14, %v1258_v21  ;;  %v1388_v20 = vmul.f32 %v1674_v2, %v1387_v28 }
 0x5b3   :  { %v1263_v47 = vsel %vm1262_vm15, %v1672_v14, %v1259_v29  ;;  %v1389_v52 = vadd.f32 %v1674_v2, %v1388_v20 }
 0x5b4   :  { %v1268_v50 = vsel %vm1265_vm2, %v1267_v12, %v1263_v47 }
 0x5b5   :  { %v1286_v60 = vmul.f32 %v1285_v24, %v1268_v50  ;;  %v1393_v3 = vsel %vm1392_vm5, %v1674_v2, %v1389_v52 }
 0x5b6   :  { %v1398_v62 = vsel %vm1395_vm7, %v1397_v56, %v1393_v3 }
 0x5b7   :  { %v1287_v36 = vadd.f32 %v1286_v60, %v303_v13  ;;  %v1419_v38 = vmul.f32 %v1587_v43, %v1398_v62 }
 0x5b9   :  { %1675 = vtanh.f32 %v1287_v36  ;;  %v1420_v17 = vadd.f32 %v1419_v38, %v1375_v54 }
 0x5bb   :  { %1677 = vtanh.f32 %v1420_v17 }
 0x5bf   :  { %v1676_v5 = vpop.eup %1675 }
 0x5c0   :  { %v1290_v9 = vmul.f32 %v1676_v5, %v1289_v49 }
 0x5c1   :  { %v1678_v0 = vpop.eup %1677 }
 0x5c2   :  { %v1292_v6 = vadd.f32 %v1291_v7, %v1290_v9  ;;  %v1423_v41 = vmul.f32 %v1678_v0, %v1422_v59 }
 0x5c4   :  { %1492 = vmatmul.f32.vlgmr.msrb.gmra.mxu3 %v1292_v6  ;;  %1472 = vmatmul.f32.vlgmr.msra.gmra.mxu2 %v1423_v41 }
 0x647   :  { %v1493_v55 = vpop.f32.mrf.mxu3  ;;  %v1473_v39 = vpop.f32.mrf.mxu2 }
 0x648   :  { %v1494_v44 = vadd.f32 %v1493_v55, %v1473_v39 }
 0x64a   :  { %v1500_v37 = vadd.f32 %v1588_v48, %v1494_v44 }
 0x64c   :  { %1501 = vst [vmem:[#allocation14] sm:$0xff] %v1500_v37 }
 0x64d   :  { %1512 = dma.vmem_to_hbm [thread:$0]  %s1508_s4, 128, %s1510_s26, [#allocation5]  }
 0x64e   :  { %1904 = dma.done.wait [#allocation5], 128  }
 0x64f   :  { %1905 = vsyncadd [#allocation5], 4294967168 }
 0x650   :  { %1517 = vsyncpa [#allocation4], 1 }
 0x651   :  { %1518 = vsyncpa [#allocation7], 1 }
 0x652   :  { %1519 = vsyncpa [#allocation10], 1 }
 0x653   :  { %1520 = vsyncpa [#allocation13], 1 }
 0x654   :  { %1521 = vsyncpa [#allocation5], 1 }

</bundles_post_ra>
